<compile_context>
chip_gen: v7x
topology: tpu7x:2x2x1
jax: 0.10.0
libtpu: 0.0.40
codegen_flags: <defaults>
</compile_context>

<pallas_src>
import functools

import numpy as np
import jax
import jax.numpy as jnp
from jax.experimental import pallas as pl
from jax.experimental.pallas import tpu as pltpu

C_PAD = 128  # lane-dense channel padding for all layers


# ---------------------------------------------------------------------------
# Fused Pallas kernel: conv1 -> pool1 -> conv2 -> pool2 -> conv3 -> conv4
# ---------------------------------------------------------------------------
def _fused_basenet_kernel(cols1_ref, w1_ref, b1_ref,
                          s1_ref, w2_ref, b2_ref,
                          g2_ref, s2_ref, w3_ref, b3_ref,
                          g3_ref, w4_ref, b4_ref,
                          out_ref):
    f32 = jnp.float32
    dot = functools.partial(jnp.dot, preferred_element_type=f32)

    # conv1 + ReLU : (M1, K1) @ (K1, 128) -> (M1, 128)
    a1 = jnp.maximum(dot(cols1_ref[0], w1_ref[...]) + b1_ref[...], 0.0)

    # pool1 (2x2 / stride 2): four 0/1 selection matmuls + elementwise max
    p1 = dot(s1_ref[0], a1)
    for k in range(1, s1_ref.shape[0]):
        p1 = jnp.maximum(p1, dot(s1_ref[k], a1))

    # conv2 + ReLU : sum over 3x3 taps of (gather @ p1) @ W2_tap
    acc2 = jnp.zeros((g2_ref.shape[1], w2_ref.shape[2]), f32)
    for t in range(g2_ref.shape[0]):
        acc2 = acc2 + dot(dot(g2_ref[t], p1), w2_ref[t])
    a2 = jnp.maximum(acc2 + b2_ref[...], 0.0)

    # pool2 (2x2 / stride 2)
    p2 = dot(s2_ref[0], a2)
    for k in range(1, s2_ref.shape[0]):
        p2 = jnp.maximum(p2, dot(s2_ref[k], a2))

    # conv3 + ReLU : sum over 2x2 taps of (gather @ p2) @ W3_tap
    acc3 = jnp.zeros((g3_ref.shape[1], w3_ref.shape[2]), f32)
    for t in range(g3_ref.shape[0]):
        acc3 = acc3 + dot(dot(g3_ref[t], p2), w3_ref[t])
    a3 = jnp.maximum(acc3 + b3_ref[...], 0.0)

    # conv4 (1x1, no activation) : (M3, 128) @ (128, 128)
    y = dot(a3, w4_ref[...]) + b4_ref[...]
    out_ref[0] = y.astype(out_ref.dtype)


# ---------------------------------------------------------------------------
# Constant helpers (built once at trace time; numpy -> embedded constants)
# ---------------------------------------------------------------------------
def _pool_select_mats(h, w):
    """0/1 matrices selecting each of the 4 elements of every 2x2 window."""
    ho, wo = h // 2, w // 2
    mats = np.zeros((4, ho * wo, h * w), np.float32)
    for k, (di, dj) in enumerate(((0, 0), (0, 1), (1, 0), (1, 1))):
        for oh in range(ho):
            for ow in range(wo):
                mats[k, oh * wo + ow, (2 * oh + di) * w + (2 * ow + dj)] = 1.0
    return jnp.asarray(mats)


def _conv_gather_mats(h, w, kh, kw):
    """Per-tap 0/1 row-gather matrices (im2col as MXU matmuls)."""
    ho, wo = h - kh + 1, w - kw + 1
    mats = np.zeros((kh * kw, ho * wo, h * w), np.float32)
    for i in range(kh):
        for j in range(kw):
            for oh in range(ho):
                for ow in range(wo):
                    mats[i * kw + j, oh * wo + ow, (oh + i) * w + (ow + j)] = 1.0
    return jnp.asarray(mats)


def _pad_tap_weights(w_hwio, cin_pad, cout_pad):
    kh, kw, cin, cout = w_hwio.shape
    taps = w_hwio.reshape(kh * kw, cin, cout)
    return jnp.zeros((kh * kw, cin_pad, cout_pad), jnp.float32).at[
        :, :cin, :cout].set(taps)


def _pad_bias(b, cpad):
    return jnp.zeros((1, cpad), jnp.float32).at[0, :b.shape[0]].set(b)


def _im2col_cin1(x_nhw, kh, kw):
    n, h, w = x_nhw.shape
    ho, wo = h - kh + 1, w - kw + 1
    patches = [x_nhw[:, i:i + ho, j:j + wo] for i in range(kh) for j in range(kw)]
    cols = jnp.stack(patches, axis=-1)               # (N, Ho, Wo, KH*KW)
    return cols.reshape(n, ho * wo, kh * kw)


def _const_spec(shape):
    zeros = (0,) * len(shape)
    return pl.BlockSpec(shape, lambda i: zeros)


# ---------------------------------------------------------------------------
# Forward pass (NCHW in / NCHW out, matches BaseNet.forward semantics)
# ---------------------------------------------------------------------------
@jax.jit
def basenet_forward(x_nchw, params):
    n, _, h, w = x_nchw.shape
    wt1, bb1 = params["conv1"]   # (3,3,1,8)
    wt2, bb2 = params["conv2"]   # (3,3,8,16)
    wt3, bb3 = params["conv3"]   # (2,2,16,128)
    wt4, bb4 = params["conv4"]   # (1,1,128,113)

    kh1, kw1, _, c1 = wt1.shape
    kh2, kw2, _, c2 = wt2.shape
    kh3, kw3, _, c3 = wt3.shape
    _, _, c3_in, c4 = wt4.shape

    # Spatial bookkeeping through the stack.
    h1, w1 = h - kh1 + 1, w - kw1 + 1          # conv1 out
    hp1, wp1 = h1 // 2, w1 // 2                # pool1 out
    h2, w2 = hp1 - kh2 + 1, wp1 - kw2 + 1      # conv2 out
    hp2, wp2 = h2 // 2, w2 // 2                # pool2 out
    h3, w3 = hp2 - kh3 + 1, wp2 - kw3 + 1      # conv3 / conv4 out
    m_out = h3 * w3

    # Kernel inputs: tiny im2col of the raw input + lane-padded weights/biases
    # + constant 0/1 gather & pool-selection matrices.
    cols1 = _im2col_cin1(x_nchw[:, 0], kh1, kw1)                      # (N, 196, 9)
    w1mat = jnp.zeros((kh1 * kw1, C_PAD), jnp.float32).at[:, :c1].set(
        wt1.reshape(kh1 * kw1, c1))
    w2taps = _pad_tap_weights(wt2, C_PAD, C_PAD)                      # (9,128,128)
    w3taps = _pad_tap_weights(wt3, C_PAD, C_PAD)                      # (4,128,128)
    w4mat = jnp.zeros((C_PAD, C_PAD), jnp.float32).at[:c3_in, :c4].set(
        wt4.reshape(c3_in, c4))
    b1p, b2p, b3p, b4p = (_pad_bias(b, C_PAD) for b in (bb1, bb2, bb3, bb4))

    s1 = _pool_select_mats(h1, w1)                                    # (4,49,196)
    g2 = _conv_gather_mats(hp1, wp1, kh2, kw2)                        # (9,25,49)
    s2 = _pool_select_mats(h2, w2)                                    # (4,4,25)
    g3 = _conv_gather_mats(hp2, wp2, kh3, kw3)                        # (4,1,4)

    out = pl.pallas_call(
        _fused_basenet_kernel,
        out_shape=jax.ShapeDtypeStruct((n, m_out, C_PAD), jnp.float32),
        grid=(n,),
        in_specs=[
            pl.BlockSpec((1, h1 * w1, kh1 * kw1), lambda i: (i, 0, 0)),
            _const_spec(w1mat.shape), _const_spec(b1p.shape),
            _const_spec(s1.shape), _const_spec(w2taps.shape), _const_spec(b2p.shape),
            _const_spec(g2.shape), _const_spec(s2.shape),
            _const_spec(w3taps.shape), _const_spec(b3p.shape),
            _const_spec(g3.shape), _const_spec(w4mat.shape), _const_spec(b4p.shape),
        ],
        out_specs=pl.BlockSpec((1, m_out, C_PAD), lambda i: (i, 0, 0)),
        compiler_params=pltpu.CompilerParams(
            dimension_semantics=("parallel",)),
    )(cols1, w1mat, b1p, s1, w2taps, b2p, g2, s2, w3taps, b3p, g3, w4mat, b4p)

    y = out[:, :, :c4].reshape(n, h3, w3, c4)         # drop lane padding
    return jnp.transpose(y, (0, 3, 1, 2))             # NHWC -> NCHW


# ---------------------------------------------------------------------------
# Parameter init (deterministic, PyTorch-default-style uniform bounds)
# ---------------------------------------------------------------------------
def _init_conv(key, kh, kw, cin, cout):
    kw_key, kb_key = jax.random.split(key)
    fan_in = kh * kw * cin
    bound = 1.0 / jnp.sqrt(fan_in)
    wgt = jax.random.uniform(kw_key, (kh, kw, cin, cout), jnp.float32, -bound, bound)
    b = jax.random.uniform(kb_key, (cout,), jnp.float32, -bound, bound)
    return wgt, b


def init_basenet_params(seed=0):
    keys = jax.random.split(jax.random.PRNGKey(seed), 4)
    return {
        "conv1": _init_conv(keys[0], 3, 3, 1, 8),
        "conv2": _init_conv(keys[1], 3, 3, 8, 16),
        "conv3": _init_conv(keys[2], 2, 2, 16, 128),
        "conv4": _init_conv(keys[3], 1, 1, 128, 113),
    }


# ---------------------------------------------------------------------------
# Pure-JAX reference for correctness check
# ---------------------------------------------------------------------------
def _ref_conv(x_nchw, w_hwio, b, relu):
    out = jax.lax.conv_general_dilated(
        x_nchw, w_hwio, window_strides=(1, 1), padding="VALID",
        dimension_numbers=("NCHW", "HWIO", "NCHW"))
    out = out + b[None, :, None, None]
    return jnp.maximum(out, 0.0) if relu else out


def _ref_maxpool(x_nchw):
    return jax.lax.reduce_window(
        x_nchw, -jnp.inf, jax.lax.max,
        window_dimensions=(1, 1, 2, 2), window_strides=(1, 1, 2, 2),
        padding="VALID")


def basenet_reference(x_nchw, params):
    x = _ref_conv(x_nchw, *params["conv1"], relu=True)
    x = _ref_maxpool(x)
    x = _ref_conv(x, *params["conv2"], relu=True)
    x = _ref_maxpool(x)
    x = _ref_conv(x, *params["conv3"], relu=True)
    return _ref_conv(x, *params["conv4"], relu=False)


if __name__ == "__main__":
    # Smallest spatial size that survives the stack: 16 -> 14 -> 7 -> 5 -> 2 -> 1.
    key = jax.random.PRNGKey(0)
    x = jax.random.normal(key, (2, 1, 16, 16), dtype=jnp.float32)

    params = init_basenet_params(seed=0)

    y = jax.block_until_ready(basenet_forward(x, params))
    assert y.shape == (2, 113, 1, 1), y.shape

    y_ref = jax.block_until_ready(basenet_reference(x, params))
    assert jnp.allclose(y, y_ref, atol=2e-4, rtol=2e-4), (
        float(jnp.max(jnp.abs(y - y_ref))))

    print("KERNEL_OK")
</pallas_src>

<mosaic_0001>
module attributes {stable_mosaic.version = 11 : i64} {
  func.func @_fused_basenet_kernel(%arg0: i32, %arg1: memref<1x196x9xf32, #tpu.memory_space<vmem>>, %arg2: memref<9x128xf32, #tpu.memory_space<vmem>>, %arg3: memref<1x128xf32, #tpu.memory_space<vmem>>, %arg4: memref<4x49x196xf32, #tpu.memory_space<vmem>>, %arg5: memref<9x128x128xf32, #tpu.memory_space<vmem>>, %arg6: memref<1x128xf32, #tpu.memory_space<vmem>>, %arg7: memref<9x25x49xf32, #tpu.memory_space<vmem>>, %arg8: memref<4x4x25xf32, #tpu.memory_space<vmem>>, %arg9: memref<4x128x128xf32, #tpu.memory_space<vmem>>, %arg10: memref<1x128xf32, #tpu.memory_space<vmem>>, %arg11: memref<4x1x4xf32, #tpu.memory_space<vmem>>, %arg12: memref<128x128xf32, #tpu.memory_space<vmem>>, %arg13: memref<1x128xf32, #tpu.memory_space<vmem>>, %arg14: memref<1x1x128xf32, #tpu.memory_space<vmem>>) attributes {dimension_semantics = [#tpu.dimension_semantics<parallel>], iteration_bounds = array<i64: 2>, scalar_prefetch = 0 : i64, scratch_operands = 0 : i64, tpu.core_type = #tpu.core_type<tc>, window_params = [{transform_indices = @transform_0, window_bounds = array<i64: 1, 196, 9>}, {pipeline_mode = #tpu.pipeline_mode<synchronous>, transform_indices = @transform_1, window_bounds = array<i64: 9, 128>}, {pipeline_mode = #tpu.pipeline_mode<synchronous>, transform_indices = @transform_2, window_bounds = array<i64: 1, 128>}, {pipeline_mode = #tpu.pipeline_mode<synchronous>, transform_indices = @transform_3, window_bounds = array<i64: 4, 49, 196>}, {pipeline_mode = #tpu.pipeline_mode<synchronous>, transform_indices = @transform_4, window_bounds = array<i64: 9, 128, 128>}, {pipeline_mode = #tpu.pipeline_mode<synchronous>, transform_indices = @transform_5, window_bounds = array<i64: 1, 128>}, {pipeline_mode = #tpu.pipeline_mode<synchronous>, transform_indices = @transform_6, window_bounds = array<i64: 9, 25, 49>}, {pipeline_mode = #tpu.pipeline_mode<synchronous>, transform_indices = @transform_7, window_bounds = array<i64: 4, 4, 25>}, {pipeline_mode = #tpu.pipeline_mode<synchronous>, transform_indices = @transform_8, window_bounds = array<i64: 4, 128, 128>}, {pipeline_mode = #tpu.pipeline_mode<synchronous>, transform_indices = @transform_9, window_bounds = array<i64: 1, 128>}, {pipeline_mode = #tpu.pipeline_mode<synchronous>, transform_indices = @transform_10, window_bounds = array<i64: 4, 1, 4>}, {pipeline_mode = #tpu.pipeline_mode<synchronous>, transform_indices = @transform_11, window_bounds = array<i64: 128, 128>}, {pipeline_mode = #tpu.pipeline_mode<synchronous>, transform_indices = @transform_12, window_bounds = array<i64: 1, 128>}, {transform_indices = @transform_13, window_bounds = array<i64: 1, 1, 128>}]} {
    %c0 = arith.constant 0 : index
    %c0_0 = arith.constant 0 : index
    %c0_1 = arith.constant 0 : index
    %0 = vector.load %arg1[%c0, %c0_0, %c0_1] : memref<1x196x9xf32, #tpu.memory_space<vmem>>, vector<1x196x9xf32>
    %1 = vector.shape_cast %0 : vector<1x196x9xf32> to vector<196x9xf32>
    %c0_2 = arith.constant 0 : index
    %c0_3 = arith.constant 0 : index
    %2 = vector.load %arg2[%c0_2, %c0_3] : memref<9x128xf32, #tpu.memory_space<vmem>>, vector<9x128xf32>
    %cst = arith.constant dense<0.000000e+00> : vector<196x128xf32>
    %3 = tpu.matmul %1, %2, %cst {dimension_numbers = #tpu.dot_dimension_numbers<[1], [0], [0], [1], [0, 0, 1, 1], [], []>} : vector<196x9xf32>, vector<9x128xf32>, vector<196x128xf32> -> vector<196x128xf32>
    %c0_4 = arith.constant 0 : index
    %c0_5 = arith.constant 0 : index
    %4 = vector.load %arg3[%c0_4, %c0_5] : memref<1x128xf32, #tpu.memory_space<vmem>>, vector<1x128xf32>
    %5 = vector.broadcast %4 : vector<1x128xf32> to vector<196x128xf32>
    %6 = arith.addf %3, %5 : vector<196x128xf32>
    %cst_6 = arith.constant 0.000000e+00 : f32
    %7 = vector.broadcast %cst_6 : f32 to vector<196x128xf32>
    %8 = arith.maximumf %6, %7 : vector<196x128xf32>
    %c0_7 = arith.constant 0 : index
    %c0_8 = arith.constant 0 : index
    %c0_9 = arith.constant 0 : index
    %9 = vector.load %arg4[%c0_7, %c0_8, %c0_9] : memref<4x49x196xf32, #tpu.memory_space<vmem>>, vector<1x49x196xf32>
    %10 = vector.shape_cast %9 : vector<1x49x196xf32> to vector<49x196xf32>
    %cst_10 = arith.constant dense<0.000000e+00> : vector<49x128xf32>
    %11 = tpu.matmul %10, %8, %cst_10 {dimension_numbers = #tpu.dot_dimension_numbers<[1], [0], [0], [1], [0, 0, 1, 1], [], []>} : vector<49x196xf32>, vector<196x128xf32>, vector<49x128xf32> -> vector<49x128xf32>
    %c1 = arith.constant 1 : index
    %c0_11 = arith.constant 0 : index
    %c0_12 = arith.constant 0 : index
    %12 = vector.load %arg4[%c1, %c0_11, %c0_12] : memref<4x49x196xf32, #tpu.memory_space<vmem>>, vector<1x49x196xf32>
    %13 = vector.shape_cast %12 : vector<1x49x196xf32> to vector<49x196xf32>
    %cst_13 = arith.constant dense<0.000000e+00> : vector<49x128xf32>
    %14 = tpu.matmul %13, %8, %cst_13 {dimension_numbers = #tpu.dot_dimension_numbers<[1], [0], [0], [1], [0, 0, 1, 1], [], []>} : vector<49x196xf32>, vector<196x128xf32>, vector<49x128xf32> -> vector<49x128xf32>
    %15 = arith.maximumf %11, %14 : vector<49x128xf32>
    %c2 = arith.constant 2 : index
    %c0_14 = arith.constant 0 : index
    %c0_15 = arith.constant 0 : index
    %16 = vector.load %arg4[%c2, %c0_14, %c0_15] : memref<4x49x196xf32, #tpu.memory_space<vmem>>, vector<1x49x196xf32>
    %17 = vector.shape_cast %16 : vector<1x49x196xf32> to vector<49x196xf32>
    %cst_16 = arith.constant dense<0.000000e+00> : vector<49x128xf32>
    %18 = tpu.matmul %17, %8, %cst_16 {dimension_numbers = #tpu.dot_dimension_numbers<[1], [0], [0], [1], [0, 0, 1, 1], [], []>} : vector<49x196xf32>, vector<196x128xf32>, vector<49x128xf32> -> vector<49x128xf32>
    %19 = arith.maximumf %15, %18 : vector<49x128xf32>
    %c3 = arith.constant 3 : index
    %c0_17 = arith.constant 0 : index
    %c0_18 = arith.constant 0 : index
    %20 = vector.load %arg4[%c3, %c0_17, %c0_18] : memref<4x49x196xf32, #tpu.memory_space<vmem>>, vector<1x49x196xf32>
    %21 = vector.shape_cast %20 : vector<1x49x196xf32> to vector<49x196xf32>
    %cst_19 = arith.constant dense<0.000000e+00> : vector<49x128xf32>
    %22 = tpu.matmul %21, %8, %cst_19 {dimension_numbers = #tpu.dot_dimension_numbers<[1], [0], [0], [1], [0, 0, 1, 1], [], []>} : vector<49x196xf32>, vector<196x128xf32>, vector<49x128xf32> -> vector<49x128xf32>
    %23 = arith.maximumf %19, %22 : vector<49x128xf32>
    %cst_20 = arith.constant 0.000000e+00 : f32
    %24 = vector.broadcast %cst_20 : f32 to vector<25x128xf32>
    %c0_21 = arith.constant 0 : index
    %c0_22 = arith.constant 0 : index
    %c0_23 = arith.constant 0 : index
    %25 = vector.load %arg7[%c0_21, %c0_22, %c0_23] : memref<9x25x49xf32, #tpu.memory_space<vmem>>, vector<1x25x49xf32>
    %26 = vector.shape_cast %25 : vector<1x25x49xf32> to vector<25x49xf32>
    %cst_24 = arith.constant dense<0.000000e+00> : vector<25x128xf32>
    %27 = tpu.matmul %26, %23, %cst_24 {dimension_numbers = #tpu.dot_dimension_numbers<[1], [0], [0], [1], [0, 0, 1, 1], [], []>} : vector<25x49xf32>, vector<49x128xf32>, vector<25x128xf32> -> vector<25x128xf32>
    %c0_25 = arith.constant 0 : index
    %c0_26 = arith.constant 0 : index
    %c0_27 = arith.constant 0 : index
    %28 = vector.load %arg5[%c0_25, %c0_26, %c0_27] : memref<9x128x128xf32, #tpu.memory_space<vmem>>, vector<1x128x128xf32>
    %29 = vector.shape_cast %28 : vector<1x128x128xf32> to vector<128x128xf32>
    %cst_28 = arith.constant dense<0.000000e+00> : vector<25x128xf32>
    %30 = tpu.matmul %27, %29, %cst_28 {dimension_numbers = #tpu.dot_dimension_numbers<[1], [0], [0], [1], [0, 0, 1, 1], [], []>} : vector<25x128xf32>, vector<128x128xf32>, vector<25x128xf32> -> vector<25x128xf32>
    %31 = arith.addf %24, %30 : vector<25x128xf32>
    %c1_29 = arith.constant 1 : index
    %c0_30 = arith.constant 0 : index
    %c0_31 = arith.constant 0 : index
    %32 = vector.load %arg7[%c1_29, %c0_30, %c0_31] : memref<9x25x49xf32, #tpu.memory_space<vmem>>, vector<1x25x49xf32>
    %33 = vector.shape_cast %32 : vector<1x25x49xf32> to vector<25x49xf32>
    %cst_32 = arith.constant dense<0.000000e+00> : vector<25x128xf32>
    %34 = tpu.matmul %33, %23, %cst_32 {dimension_numbers = #tpu.dot_dimension_numbers<[1], [0], [0], [1], [0, 0, 1, 1], [], []>} : vector<25x49xf32>, vector<49x128xf32>, vector<25x128xf32> -> vector<25x128xf32>
    %c1_33 = arith.constant 1 : index
    %c0_34 = arith.constant 0 : index
    %c0_35 = arith.constant 0 : index
    %35 = vector.load %arg5[%c1_33, %c0_34, %c0_35] : memref<9x128x128xf32, #tpu.memory_space<vmem>>, vector<1x128x128xf32>
    %36 = vector.shape_cast %35 : vector<1x128x128xf32> to vector<128x128xf32>
    %cst_36 = arith.constant dense<0.000000e+00> : vector<25x128xf32>
    %37 = tpu.matmul %34, %36, %cst_36 {dimension_numbers = #tpu.dot_dimension_numbers<[1], [0], [0], [1], [0, 0, 1, 1], [], []>} : vector<25x128xf32>, vector<128x128xf32>, vector<25x128xf32> -> vector<25x128xf32>
    %38 = arith.addf %31, %37 : vector<25x128xf32>
    %c2_37 = arith.constant 2 : index
    %c0_38 = arith.constant 0 : index
    %c0_39 = arith.constant 0 : index
    %39 = vector.load %arg7[%c2_37, %c0_38, %c0_39] : memref<9x25x49xf32, #tpu.memory_space<vmem>>, vector<1x25x49xf32>
    %40 = vector.shape_cast %39 : vector<1x25x49xf32> to vector<25x49xf32>
    %cst_40 = arith.constant dense<0.000000e+00> : vector<25x128xf32>
    %41 = tpu.matmul %40, %23, %cst_40 {dimension_numbers = #tpu.dot_dimension_numbers<[1], [0], [0], [1], [0, 0, 1, 1], [], []>} : vector<25x49xf32>, vector<49x128xf32>, vector<25x128xf32> -> vector<25x128xf32>
    %c2_41 = arith.constant 2 : index
    %c0_42 = arith.constant 0 : index
    %c0_43 = arith.constant 0 : index
    %42 = vector.load %arg5[%c2_41, %c0_42, %c0_43] : memref<9x128x128xf32, #tpu.memory_space<vmem>>, vector<1x128x128xf32>
    %43 = vector.shape_cast %42 : vector<1x128x128xf32> to vector<128x128xf32>
    %cst_44 = arith.constant dense<0.000000e+00> : vector<25x128xf32>
    %44 = tpu.matmul %41, %43, %cst_44 {dimension_numbers = #tpu.dot_dimension_numbers<[1], [0], [0], [1], [0, 0, 1, 1], [], []>} : vector<25x128xf32>, vector<128x128xf32>, vector<25x128xf32> -> vector<25x128xf32>
    %45 = arith.addf %38, %44 : vector<25x128xf32>
    %c3_45 = arith.constant 3 : index
    %c0_46 = arith.constant 0 : index
    %c0_47 = arith.constant 0 : index
    %46 = vector.load %arg7[%c3_45, %c0_46, %c0_47] : memref<9x25x49xf32, #tpu.memory_space<vmem>>, vector<1x25x49xf32>
    %47 = vector.shape_cast %46 : vector<1x25x49xf32> to vector<25x49xf32>
    %cst_48 = arith.constant dense<0.000000e+00> : vector<25x128xf32>
    %48 = tpu.matmul %47, %23, %cst_48 {dimension_numbers = #tpu.dot_dimension_numbers<[1], [0], [0], [1], [0, 0, 1, 1], [], []>} : vector<25x49xf32>, vector<49x128xf32>, vector<25x128xf32> -> vector<25x128xf32>
    %c3_49 = arith.constant 3 : index
    %c0_50 = arith.constant 0 : index
    %c0_51 = arith.constant 0 : index
    %49 = vector.load %arg5[%c3_49, %c0_50, %c0_51] : memref<9x128x128xf32, #tpu.memory_space<vmem>>, vector<1x128x128xf32>
    %50 = vector.shape_cast %49 : vector<1x128x128xf32> to vector<128x128xf32>
    %cst_52 = arith.constant dense<0.000000e+00> : vector<25x128xf32>
    %51 = tpu.matmul %48, %50, %cst_52 {dimension_numbers = #tpu.dot_dimension_numbers<[1], [0], [0], [1], [0, 0, 1, 1], [], []>} : vector<25x128xf32>, vector<128x128xf32>, vector<25x128xf32> -> vector<25x128xf32>
    %52 = arith.addf %45, %51 : vector<25x128xf32>
    %c4 = arith.constant 4 : index
    %c0_53 = arith.constant 0 : index
    %c0_54 = arith.constant 0 : index
    %53 = vector.load %arg7[%c4, %c0_53, %c0_54] : memref<9x25x49xf32, #tpu.memory_space<vmem>>, vector<1x25x49xf32>
    %54 = vector.shape_cast %53 : vector<1x25x49xf32> to vector<25x49xf32>
    %cst_55 = arith.constant dense<0.000000e+00> : vector<25x128xf32>
    %55 = tpu.matmul %54, %23, %cst_55 {dimension_numbers = #tpu.dot_dimension_numbers<[1], [0], [0], [1], [0, 0, 1, 1], [], []>} : vector<25x49xf32>, vector<49x128xf32>, vector<25x128xf32> -> vector<25x128xf32>
    %c4_56 = arith.constant 4 : index
    %c0_57 = arith.constant 0 : index
    %c0_58 = arith.constant 0 : index
    %56 = vector.load %arg5[%c4_56, %c0_57, %c0_58] : memref<9x128x128xf32, #tpu.memory_space<vmem>>, vector<1x128x128xf32>
    %57 = vector.shape_cast %56 : vector<1x128x128xf32> to vector<128x128xf32>
    %cst_59 = arith.constant dense<0.000000e+00> : vector<25x128xf32>
    %58 = tpu.matmul %55, %57, %cst_59 {dimension_numbers = #tpu.dot_dimension_numbers<[1], [0], [0], [1], [0, 0, 1, 1], [], []>} : vector<25x128xf32>, vector<128x128xf32>, vector<25x128xf32> -> vector<25x128xf32>
    %59 = arith.addf %52, %58 : vector<25x128xf32>
    %c5 = arith.constant 5 : index
    %c0_60 = arith.constant 0 : index
    %c0_61 = arith.constant 0 : index
    %60 = vector.load %arg7[%c5, %c0_60, %c0_61] : memref<9x25x49xf32, #tpu.memory_space<vmem>>, vector<1x25x49xf32>
    %61 = vector.shape_cast %60 : vector<1x25x49xf32> to vector<25x49xf32>
    %cst_62 = arith.constant dense<0.000000e+00> : vector<25x128xf32>
    %62 = tpu.matmul %61, %23, %cst_62 {dimension_numbers = #tpu.dot_dimension_numbers<[1], [0], [0], [1], [0, 0, 1, 1], [], []>} : vector<25x49xf32>, vector<49x128xf32>, vector<25x128xf32> -> vector<25x128xf32>
    %c5_63 = arith.constant 5 : index
    %c0_64 = arith.constant 0 : index
    %c0_65 = arith.constant 0 : index
    %63 = vector.load %arg5[%c5_63, %c0_64, %c0_65] : memref<9x128x128xf32, #tpu.memory_space<vmem>>, vector<1x128x128xf32>
    %64 = vector.shape_cast %63 : vector<1x128x128xf32> to vector<128x128xf32>
    %cst_66 = arith.constant dense<0.000000e+00> : vector<25x128xf32>
    %65 = tpu.matmul %62, %64, %cst_66 {dimension_numbers = #tpu.dot_dimension_numbers<[1], [0], [0], [1], [0, 0, 1, 1], [], []>} : vector<25x128xf32>, vector<128x128xf32>, vector<25x128xf32> -> vector<25x128xf32>
    %66 = arith.addf %59, %65 : vector<25x128xf32>
    %c6 = arith.constant 6 : index
    %c0_67 = arith.constant 0 : index
    %c0_68 = arith.constant 0 : index
    %67 = vector.load %arg7[%c6, %c0_67, %c0_68] : memref<9x25x49xf32, #tpu.memory_space<vmem>>, vector<1x25x49xf32>
    %68 = vector.shape_cast %67 : vector<1x25x49xf32> to vector<25x49xf32>
    %cst_69 = arith.constant dense<0.000000e+00> : vector<25x128xf32>
    %69 = tpu.matmul %68, %23, %cst_69 {dimension_numbers = #tpu.dot_dimension_numbers<[1], [0], [0], [1], [0, 0, 1, 1], [], []>} : vector<25x49xf32>, vector<49x128xf32>, vector<25x128xf32> -> vector<25x128xf32>
    %c6_70 = arith.constant 6 : index
    %c0_71 = arith.constant 0 : index
    %c0_72 = arith.constant 0 : index
    %70 = vector.load %arg5[%c6_70, %c0_71, %c0_72] : memref<9x128x128xf32, #tpu.memory_space<vmem>>, vector<1x128x128xf32>
    %71 = vector.shape_cast %70 : vector<1x128x128xf32> to vector<128x128xf32>
    %cst_73 = arith.constant dense<0.000000e+00> : vector<25x128xf32>
    %72 = tpu.matmul %69, %71, %cst_73 {dimension_numbers = #tpu.dot_dimension_numbers<[1], [0], [0], [1], [0, 0, 1, 1], [], []>} : vector<25x128xf32>, vector<128x128xf32>, vector<25x128xf32> -> vector<25x128xf32>
    %73 = arith.addf %66, %72 : vector<25x128xf32>
    %c7 = arith.constant 7 : index
    %c0_74 = arith.constant 0 : index
    %c0_75 = arith.constant 0 : index
    %74 = vector.load %arg7[%c7, %c0_74, %c0_75] : memref<9x25x49xf32, #tpu.memory_space<vmem>>, vector<1x25x49xf32>
    %75 = vector.shape_cast %74 : vector<1x25x49xf32> to vector<25x49xf32>
    %cst_76 = arith.constant dense<0.000000e+00> : vector<25x128xf32>
    %76 = tpu.matmul %75, %23, %cst_76 {dimension_numbers = #tpu.dot_dimension_numbers<[1], [0], [0], [1], [0, 0, 1, 1], [], []>} : vector<25x49xf32>, vector<49x128xf32>, vector<25x128xf32> -> vector<25x128xf32>
    %c7_77 = arith.constant 7 : index
    %c0_78 = arith.constant 0 : index
    %c0_79 = arith.constant 0 : index
    %77 = vector.load %arg5[%c7_77, %c0_78, %c0_79] : memref<9x128x128xf32, #tpu.memory_space<vmem>>, vector<1x128x128xf32>
    %78 = vector.shape_cast %77 : vector<1x128x128xf32> to vector<128x128xf32>
    %cst_80 = arith.constant dense<0.000000e+00> : vector<25x128xf32>
    %79 = tpu.matmul %76, %78, %cst_80 {dimension_numbers = #tpu.dot_dimension_numbers<[1], [0], [0], [1], [0, 0, 1, 1], [], []>} : vector<25x128xf32>, vector<128x128xf32>, vector<25x128xf32> -> vector<25x128xf32>
    %80 = arith.addf %73, %79 : vector<25x128xf32>
    %c8 = arith.constant 8 : index
    %c0_81 = arith.constant 0 : index
    %c0_82 = arith.constant 0 : index
    %81 = vector.load %arg7[%c8, %c0_81, %c0_82] : memref<9x25x49xf32, #tpu.memory_space<vmem>>, vector<1x25x49xf32>
    %82 = vector.shape_cast %81 : vector<1x25x49xf32> to vector<25x49xf32>
    %cst_83 = arith.constant dense<0.000000e+00> : vector<25x128xf32>
    %83 = tpu.matmul %82, %23, %cst_83 {dimension_numbers = #tpu.dot_dimension_numbers<[1], [0], [0], [1], [0, 0, 1, 1], [], []>} : vector<25x49xf32>, vector<49x128xf32>, vector<25x128xf32> -> vector<25x128xf32>
    %c8_84 = arith.constant 8 : index
    %c0_85 = arith.constant 0 : index
    %c0_86 = arith.constant 0 : index
    %84 = vector.load %arg5[%c8_84, %c0_85, %c0_86] : memref<9x128x128xf32, #tpu.memory_space<vmem>>, vector<1x128x128xf32>
    %85 = vector.shape_cast %84 : vector<1x128x128xf32> to vector<128x128xf32>
    %cst_87 = arith.constant dense<0.000000e+00> : vector<25x128xf32>
    %86 = tpu.matmul %83, %85, %cst_87 {dimension_numbers = #tpu.dot_dimension_numbers<[1], [0], [0], [1], [0, 0, 1, 1], [], []>} : vector<25x128xf32>, vector<128x128xf32>, vector<25x128xf32> -> vector<25x128xf32>
    %87 = arith.addf %80, %86 : vector<25x128xf32>
    %c0_88 = arith.constant 0 : index
    %c0_89 = arith.constant 0 : index
    %88 = vector.load %arg6[%c0_88, %c0_89] : memref<1x128xf32, #tpu.memory_space<vmem>>, vector<1x128xf32>
    %89 = vector.broadcast %88 : vector<1x128xf32> to vector<25x128xf32>
    %90 = arith.addf %87, %89 : vector<25x128xf32>
    %cst_90 = arith.constant 0.000000e+00 : f32
    %91 = vector.broadcast %cst_90 : f32 to vector<25x128xf32>
    %92 = arith.maximumf %90, %91 : vector<25x128xf32>
    %c0_91 = arith.constant 0 : index
    %c0_92 = arith.constant 0 : index
    %c0_93 = arith.constant 0 : index
    %93 = vector.load %arg8[%c0_91, %c0_92, %c0_93] : memref<4x4x25xf32, #tpu.memory_space<vmem>>, vector<1x4x25xf32>
    %94 = vector.shape_cast %93 : vector<1x4x25xf32> to vector<4x25xf32>
    %cst_94 = arith.constant dense<0.000000e+00> : vector<4x128xf32>
    %95 = tpu.matmul %94, %92, %cst_94 {dimension_numbers = #tpu.dot_dimension_numbers<[1], [0], [0], [1], [0, 0, 1, 1], [], []>} : vector<4x25xf32>, vector<25x128xf32>, vector<4x128xf32> -> vector<4x128xf32>
    %c1_95 = arith.constant 1 : index
    %c0_96 = arith.constant 0 : index
    %c0_97 = arith.constant 0 : index
    %96 = vector.load %arg8[%c1_95, %c0_96, %c0_97] : memref<4x4x25xf32, #tpu.memory_space<vmem>>, vector<1x4x25xf32>
    %97 = vector.shape_cast %96 : vector<1x4x25xf32> to vector<4x25xf32>
    %cst_98 = arith.constant dense<0.000000e+00> : vector<4x128xf32>
    %98 = tpu.matmul %97, %92, %cst_98 {dimension_numbers = #tpu.dot_dimension_numbers<[1], [0], [0], [1], [0, 0, 1, 1], [], []>} : vector<4x25xf32>, vector<25x128xf32>, vector<4x128xf32> -> vector<4x128xf32>
    %99 = arith.maximumf %95, %98 : vector<4x128xf32>
    %c2_99 = arith.constant 2 : index
    %c0_100 = arith.constant 0 : index
    %c0_101 = arith.constant 0 : index
    %100 = vector.load %arg8[%c2_99, %c0_100, %c0_101] : memref<4x4x25xf32, #tpu.memory_space<vmem>>, vector<1x4x25xf32>
    %101 = vector.shape_cast %100 : vector<1x4x25xf32> to vector<4x25xf32>
    %cst_102 = arith.constant dense<0.000000e+00> : vector<4x128xf32>
    %102 = tpu.matmul %101, %92, %cst_102 {dimension_numbers = #tpu.dot_dimension_numbers<[1], [0], [0], [1], [0, 0, 1, 1], [], []>} : vector<4x25xf32>, vector<25x128xf32>, vector<4x128xf32> -> vector<4x128xf32>
    %103 = arith.maximumf %99, %102 : vector<4x128xf32>
    %c3_103 = arith.constant 3 : index
    %c0_104 = arith.constant 0 : index
    %c0_105 = arith.constant 0 : index
    %104 = vector.load %arg8[%c3_103, %c0_104, %c0_105] : memref<4x4x25xf32, #tpu.memory_space<vmem>>, vector<1x4x25xf32>
    %105 = vector.shape_cast %104 : vector<1x4x25xf32> to vector<4x25xf32>
    %cst_106 = arith.constant dense<0.000000e+00> : vector<4x128xf32>
    %106 = tpu.matmul %105, %92, %cst_106 {dimension_numbers = #tpu.dot_dimension_numbers<[1], [0], [0], [1], [0, 0, 1, 1], [], []>} : vector<4x25xf32>, vector<25x128xf32>, vector<4x128xf32> -> vector<4x128xf32>
    %107 = arith.maximumf %103, %106 : vector<4x128xf32>
    %cst_107 = arith.constant 0.000000e+00 : f32
    %108 = vector.broadcast %cst_107 : f32 to vector<1x128xf32>
    %c0_108 = arith.constant 0 : index
    %c0_109 = arith.constant 0 : index
    %c0_110 = arith.constant 0 : index
    %109 = vector.load %arg11[%c0_108, %c0_109, %c0_110] : memref<4x1x4xf32, #tpu.memory_space<vmem>>, vector<1x1x4xf32>
    %110 = vector.shape_cast %109 : vector<1x1x4xf32> to vector<1x4xf32>
    %cst_111 = arith.constant dense<0.000000e+00> : vector<1x128xf32>
    %111 = tpu.matmul %110, %107, %cst_111 {dimension_numbers = #tpu.dot_dimension_numbers<[1], [0], [0], [1], [0, 0, 1, 1], [], []>} : vector<1x4xf32>, vector<4x128xf32>, vector<1x128xf32> -> vector<1x128xf32>
    %c0_112 = arith.constant 0 : index
    %c0_113 = arith.constant 0 : index
    %c0_114 = arith.constant 0 : index
    %112 = vector.load %arg9[%c0_112, %c0_113, %c0_114] : memref<4x128x128xf32, #tpu.memory_space<vmem>>, vector<1x128x128xf32>
    %113 = vector.shape_cast %112 : vector<1x128x128xf32> to vector<128x128xf32>
    %cst_115 = arith.constant dense<0.000000e+00> : vector<1x128xf32>
    %114 = tpu.matmul %111, %113, %cst_115 {dimension_numbers = #tpu.dot_dimension_numbers<[1], [0], [0], [1], [0, 0, 1, 1], [], []>} : vector<1x128xf32>, vector<128x128xf32>, vector<1x128xf32> -> vector<1x128xf32>
    %115 = arith.addf %108, %114 : vector<1x128xf32>
    %c1_116 = arith.constant 1 : index
    %c0_117 = arith.constant 0 : index
    %c0_118 = arith.constant 0 : index
    %116 = vector.load %arg11[%c1_116, %c0_117, %c0_118] : memref<4x1x4xf32, #tpu.memory_space<vmem>>, vector<1x1x4xf32>
    %117 = vector.shape_cast %116 : vector<1x1x4xf32> to vector<1x4xf32>
    %cst_119 = arith.constant dense<0.000000e+00> : vector<1x128xf32>
    %118 = tpu.matmul %117, %107, %cst_119 {dimension_numbers = #tpu.dot_dimension_numbers<[1], [0], [0], [1], [0, 0, 1, 1], [], []>} : vector<1x4xf32>, vector<4x128xf32>, vector<1x128xf32> -> vector<1x128xf32>
    %c1_120 = arith.constant 1 : index
    %c0_121 = arith.constant 0 : index
    %c0_122 = arith.constant 0 : index
    %119 = vector.load %arg9[%c1_120, %c0_121, %c0_122] : memref<4x128x128xf32, #tpu.memory_space<vmem>>, vector<1x128x128xf32>
    %120 = vector.shape_cast %119 : vector<1x128x128xf32> to vector<128x128xf32>
    %cst_123 = arith.constant dense<0.000000e+00> : vector<1x128xf32>
    %121 = tpu.matmul %118, %120, %cst_123 {dimension_numbers = #tpu.dot_dimension_numbers<[1], [0], [0], [1], [0, 0, 1, 1], [], []>} : vector<1x128xf32>, vector<128x128xf32>, vector<1x128xf32> -> vector<1x128xf32>
    %122 = arith.addf %115, %121 : vector<1x128xf32>
    %c2_124 = arith.constant 2 : index
    %c0_125 = arith.constant 0 : index
    %c0_126 = arith.constant 0 : index
    %123 = vector.load %arg11[%c2_124, %c0_125, %c0_126] : memref<4x1x4xf32, #tpu.memory_space<vmem>>, vector<1x1x4xf32>
    %124 = vector.shape_cast %123 : vector<1x1x4xf32> to vector<1x4xf32>
    %cst_127 = arith.constant dense<0.000000e+00> : vector<1x128xf32>
    %125 = tpu.matmul %124, %107, %cst_127 {dimension_numbers = #tpu.dot_dimension_numbers<[1], [0], [0], [1], [0, 0, 1, 1], [], []>} : vector<1x4xf32>, vector<4x128xf32>, vector<1x128xf32> -> vector<1x128xf32>
    %c2_128 = arith.constant 2 : index
    %c0_129 = arith.constant 0 : index
    %c0_130 = arith.constant 0 : index
    %126 = vector.load %arg9[%c2_128, %c0_129, %c0_130] : memref<4x128x128xf32, #tpu.memory_space<vmem>>, vector<1x128x128xf32>
    %127 = vector.shape_cast %126 : vector<1x128x128xf32> to vector<128x128xf32>
    %cst_131 = arith.constant dense<0.000000e+00> : vector<1x128xf32>
    %128 = tpu.matmul %125, %127, %cst_131 {dimension_numbers = #tpu.dot_dimension_numbers<[1], [0], [0], [1], [0, 0, 1, 1], [], []>} : vector<1x128xf32>, vector<128x128xf32>, vector<1x128xf32> -> vector<1x128xf32>
    %129 = arith.addf %122, %128 : vector<1x128xf32>
    %c3_132 = arith.constant 3 : index
    %c0_133 = arith.constant 0 : index
    %c0_134 = arith.constant 0 : index
    %130 = vector.load %arg11[%c3_132, %c0_133, %c0_134] : memref<4x1x4xf32, #tpu.memory_space<vmem>>, vector<1x1x4xf32>
    %131 = vector.shape_cast %130 : vector<1x1x4xf32> to vector<1x4xf32>
    %cst_135 = arith.constant dense<0.000000e+00> : vector<1x128xf32>
    %132 = tpu.matmul %131, %107, %cst_135 {dimension_numbers = #tpu.dot_dimension_numbers<[1], [0], [0], [1], [0, 0, 1, 1], [], []>} : vector<1x4xf32>, vector<4x128xf32>, vector<1x128xf32> -> vector<1x128xf32>
    %c3_136 = arith.constant 3 : index
    %c0_137 = arith.constant 0 : index
    %c0_138 = arith.constant 0 : index
    %133 = vector.load %arg9[%c3_136, %c0_137, %c0_138] : memref<4x128x128xf32, #tpu.memory_space<vmem>>, vector<1x128x128xf32>
    %134 = vector.shape_cast %133 : vector<1x128x128xf32> to vector<128x128xf32>
    %cst_139 = arith.constant dense<0.000000e+00> : vector<1x128xf32>
    %135 = tpu.matmul %132, %134, %cst_139 {dimension_numbers = #tpu.dot_dimension_numbers<[1], [0], [0], [1], [0, 0, 1, 1], [], []>} : vector<1x128xf32>, vector<128x128xf32>, vector<1x128xf32> -> vector<1x128xf32>
    %136 = arith.addf %129, %135 : vector<1x128xf32>
    %c0_140 = arith.constant 0 : index
    %c0_141 = arith.constant 0 : index
    %137 = vector.load %arg10[%c0_140, %c0_141] : memref<1x128xf32, #tpu.memory_space<vmem>>, vector<1x128xf32>
    %138 = arith.addf %136, %137 : vector<1x128xf32>
    %cst_142 = arith.constant 0.000000e+00 : f32
    %139 = vector.broadcast %cst_142 : f32 to vector<1x128xf32>
    %140 = arith.maximumf %138, %139 : vector<1x128xf32>
    %c0_143 = arith.constant 0 : index
    %c0_144 = arith.constant 0 : index
    %141 = vector.load %arg12[%c0_143, %c0_144] : memref<128x128xf32, #tpu.memory_space<vmem>>, vector<128x128xf32>
    %cst_145 = arith.constant dense<0.000000e+00> : vector<1x128xf32>
    %142 = tpu.matmul %140, %141, %cst_145 {dimension_numbers = #tpu.dot_dimension_numbers<[1], [0], [0], [1], [0, 0, 1, 1], [], []>} : vector<1x128xf32>, vector<128x128xf32>, vector<1x128xf32> -> vector<1x128xf32>
    %c0_146 = arith.constant 0 : index
    %c0_147 = arith.constant 0 : index
    %143 = vector.load %arg13[%c0_146, %c0_147] : memref<1x128xf32, #tpu.memory_space<vmem>>, vector<1x128xf32>
    %144 = arith.addf %142, %143 : vector<1x128xf32>
    %c0_148 = arith.constant 0 : index
    %c0_149 = arith.constant 0 : index
    %c0_150 = arith.constant 0 : index
    %145 = vector.load %arg14[%c0_148, %c0_149, %c0_150] : memref<1x1x128xf32, #tpu.memory_space<vmem>>, vector<1x1x128xf32>
    %146 = vector.shape_cast %145 : vector<1x1x128xf32> to vector<1x128xf32>
    %147 = vector.shape_cast %144 : vector<1x128xf32> to vector<1x1x128xf32>
    tpu.vector_store %arg14[%c0_148, %c0_149, %c0_150], %147 {strides = array<i32>} : memref<1x1x128xf32, #tpu.memory_space<vmem>>, vector<1x1x128xf32>,
    return
  }
  func.func @transform_0(%arg0: i32) -> (i32, i32, i32) {
    %c0_i32 = arith.constant 0 : i32
    %c0_i32_0 = arith.constant 0 : i32
    %c0_i32_1 = arith.constant 0 : i32
    return %arg0, %c0_i32, %c0_i32_0 : i32, i32, i32
  }
  func.func @transform_1(%arg0: i32) -> (i32, i32) {
    %c0_i32 = arith.constant 0 : i32
    %c0_i32_0 = arith.constant 0 : i32
    %c0_i32_1 = arith.constant 0 : i32
    return %c0_i32, %c0_i32_0 : i32, i32
  }
  func.func @transform_2(%arg0: i32) -> (i32, i32) {
    %c0_i32 = arith.constant 0 : i32
    %c0_i32_0 = arith.constant 0 : i32
    %c0_i32_1 = arith.constant 0 : i32
    return %c0_i32, %c0_i32_0 : i32, i32
  }
  func.func @transform_3(%arg0: i32) -> (i32, i32, i32) {
    %c0_i32 = arith.constant 0 : i32
    %c0_i32_0 = arith.constant 0 : i32
    %c0_i32_1 = arith.constant 0 : i32
    %c0_i32_2 = arith.constant 0 : i32
    return %c0_i32, %c0_i32_0, %c0_i32_1 : i32, i32, i32
  }
  func.func @transform_4(%arg0: i32) -> (i32, i32, i32) {
    %c0_i32 = arith.constant 0 : i32
    %c0_i32_0 = arith.constant 0 : i32
    %c0_i32_1 = arith.constant 0 : i32
    %c0_i32_2 = arith.constant 0 : i32
    return %c0_i32, %c0_i32_0, %c0_i32_1 : i32, i32, i32
  }
  func.func @transform_5(%arg0: i32) -> (i32, i32) {
    %c0_i32 = arith.constant 0 : i32
    %c0_i32_0 = arith.constant 0 : i32
    %c0_i32_1 = arith.constant 0 : i32
    return %c0_i32, %c0_i32_0 : i32, i32
  }
  func.func @transform_6(%arg0: i32) -> (i32, i32, i32) {
    %c0_i32 = arith.constant 0 : i32
    %c0_i32_0 = arith.constant 0 : i32
    %c0_i32_1 = arith.constant 0 : i32
    %c0_i32_2 = arith.constant 0 : i32
    return %c0_i32, %c0_i32_0, %c0_i32_1 : i32, i32, i32
  }
  func.func @transform_7(%arg0: i32) -> (i32, i32, i32) {
    %c0_i32 = arith.constant 0 : i32
    %c0_i32_0 = arith.constant 0 : i32
    %c0_i32_1 = arith.constant 0 : i32
    %c0_i32_2 = arith.constant 0 : i32
    return %c0_i32, %c0_i32_0, %c0_i32_1 : i32, i32, i32
  }
  func.func @transform_8(%arg0: i32) -> (i32, i32, i32) {
    %c0_i32 = arith.constant 0 : i32
    %c0_i32_0 = arith.constant 0 : i32
    %c0_i32_1 = arith.constant 0 : i32
    %c0_i32_2 = arith.constant 0 : i32
    return %c0_i32, %c0_i32_0, %c0_i32_1 : i32, i32, i32
  }
  func.func @transform_9(%arg0: i32) -> (i32, i32) {
    %c0_i32 = arith.constant 0 : i32
    %c0_i32_0 = arith.constant 0 : i32
    %c0_i32_1 = arith.constant 0 : i32
    return %c0_i32, %c0_i32_0 : i32, i32
  }
  func.func @transform_10(%arg0: i32) -> (i32, i32, i32) {
    %c0_i32 = arith.constant 0 : i32
    %c0_i32_0 = arith.constant 0 : i32
    %c0_i32_1 = arith.constant 0 : i32
    %c0_i32_2 = arith.constant 0 : i32
    return %c0_i32, %c0_i32_0, %c0_i32_1 : i32, i32, i32
  }
  func.func @transform_11(%arg0: i32) -> (i32, i32) {
    %c0_i32 = arith.constant 0 : i32
    %c0_i32_0 = arith.constant 0 : i32
    %c0_i32_1 = arith.constant 0 : i32
    return %c0_i32, %c0_i32_0 : i32, i32
  }
  func.func @transform_12(%arg0: i32) -> (i32, i32) {
    %c0_i32 = arith.constant 0 : i32
    %c0_i32_0 = arith.constant 0 : i32
    %c0_i32_1 = arith.constant 0 : i32
    return %c0_i32, %c0_i32_0 : i32, i32
  }
  func.func @transform_13(%arg0: i32) -> (i32, i32, i32) {
    %c0_i32 = arith.constant 0 : i32
    %c0_i32_0 = arith.constant 0 : i32
    %c0_i32_1 = arith.constant 0 : i32
    return %arg0, %c0_i32, %c0_i32_0 : i32, i32, i32
  }
}

</mosaic_0001>

<bundles_post_ra>
// kernel: basenet_forward.1
= control target key start
LH: loop header
LB: loop body
LE: loop exit
PB: predicated region body
PF: predicated region fallthrough
CT: control target
= control target key end

     0   :  { %s6777_s25 = smov 0   ;;  %s8403_s0 = inlined_call_operand.vmem [shape: f32[2,196,9], index: 0, kind: input, shape index: {}]   ;;  %s8404_s1 = inlined_call_operand.vmem [shape: f32[9,128], index: 1, kind: input, shape index: {}]   ;;  %s8405_s2 = inlined_call_operand.vmem [shape: f32[1,128], index: 2, kind: input, shape index: {}]   ;;  %s8406_s3 = inlined_call_operand.vmem [shape: f32[4,49,196], index: 3, kind: input, shape index: {}]   ;;  %s8407_s4 = inlined_call_operand.vmem [shape: f32[9,128,128], index: 4, kind: input, shape index: {}]   ;;  %s8408_s5 = inlined_call_operand.vmem [shape: f32[1,128], index: 5, kind: input, shape index: {}]   ;;  %s8409_s6 = inlined_call_operand.vmem [shape: f32[9,25,49], index: 6, kind: input, shape index: {}]   ;;  %s8410_s7 = inlined_call_operand.vmem [shape: f32[4,4,25], index: 7, kind: input, shape index: {}]   ;;  %s8411_s8 = inlined_call_operand.vmem [shape: f32[4,128,128], index: 8, kind: input, shape index: {}]   ;;  %s8412_s9 = inlined_call_operand.vmem [shape: f32[1,128], index: 9, kind: input, shape index: {}]   ;;  %s8413_s10 = inlined_call_operand.vmem [shape: f32[4,1,4], index: 10, kind: input, shape index: {}]   ;;  %s8414_s11 = inlined_call_operand.vmem [shape: f32[128,128], index: 11, kind: input, shape index: {}]   ;;  %s8415_s12 = inlined_call_operand.vmem [shape: f32[1,128], index: 12, kind: input, shape index: {}]   ;;  %s8416_s13 = inlined_call_operand.vmem [shape: f32[2,1,128], index: 13, kind: output, shape index: {}]  }
   0x1 LB: > { %s4312_s26 = sadd.s32 4294967295, %s6701_s25   ;;  %p4316_p0 = scmp.ge.s32.totalorder %s6701_s25, 1  ;;  %s6701_s25 = sphi %s6777_s25, %s23_s25  }
   0x2   : > { %p387_p1 = scmp.lt.s32.totalorder %s6701_s25, 3 }
   0x4   : > { %p388_p2 = pnand %p4316_p0, %p387_p1 }
   0x5   : > { %v462_v0 = vld [vmem:[%s8404_s1] sm:$0xff] (!%p388_p2)  ;;  %v463_v1 = vld [vmem:[%s8404_s1 + $0x8] sm:$0x1] (!%p388_p2)  ;;  %vm547_vm0 = vcmask (!%p388_p2), 1040384   ;;  %v6703_v2 = vmov (!%p388_p2), 0.0|0.0   ;;  %vm6704_vm1 = vmmov (!%p388_p2), 1  }
   0x6   : > { %391 = sbr.rel (%p388_p2) target bundleno = 2910 (0xb5e), region = 72  ;;  %5956 = vmatprep.subr.bf16.mxu0 (!%p388_p2), %v6703_v2  ;;  %v5957_v3 = vpack.c.bf16 (!%p388_p2), %v463_v1, %v462_v0  ;;  %vm6793_vm2 = vmpackc.low (!%p388_p2), %vm547_vm0, %vm6704_vm1  ;;  %p429_p3 = scmp.lt.s32.totalorder (!%p388_p2), %s4312_s26, 1  ;;  %6648 = vmatprep.subr.bf16.mxu1 (!%p388_p2), %v6703_v2  ;;  %vm6705_vm3 = vmmov (!%p388_p2), 0   ;;  %v6706_v5 = vmov (!%p388_p2), 0.0   ;;  %vm471_vm4 = vcmask (!%p388_p2), 72704   ;;  %v767_v31 = vld [vmem:[%s8406_s3 + $0x8] sm:$0xff] (!%p388_p2) }
   0x7   : > { %5120 = vmatprep.mubr.msk.f32.mxu0 (!%p388_p2), %vm6705_vm3, %v6706_v5  ;;  %5159 = vmatprep.mubr.msk.f32.mxu1 (!%p388_p2), %vm6705_vm3, %v6706_v5  ;;  %vm780_vm5 = vcmask (!%p388_p2), 556032   ;;  %v6919_v32 = vld [vmem:[%s8405_s2] ss:$0 sm:$0xff] (!%p388_p2)  ;;  %v4376_v36 = vld [vmem:[%s8406_s3 + $0xe8] sm:$0xff] (!%p388_p2)  ;;  %vm802_vm6 = vcmask (!%p388_p2), 1043456   ;;  %vm1339_vm7 = vcmask (!%p388_p2), 400384  }
   0x8   : > { %5959 = vmatpush3.bf16.msk.msra.mxu0 (!%p388_p2), %vm6793_vm2, %v5957_v3  ;;  %6649 = vmatpush3.bf16.msk.msra.mxu1 (!%p388_p2), %vm6793_vm2, %v5957_v3  ;;  %vm3217_vm8 = vcmask (!%p388_p2), 203776   ;;  %vm3523_vm9 = vcmask (!%p388_p2), 31744  }
   0x9   : > { %5960 = vmatprep.subr.bf16.mxu1 (!%p388_p2), %v6703_v2  ;;  %6032 = vmatprep.subr.bf16.mxu0 (!%p388_p2), %v6703_v2 }
   0xd   : > { %s8420_s26 = smov (!%p429_p3, %s4312_s26), 1 }
   0xe   : > { %s6682_s14 = smul.u32 200, %s8420_s26  ;;  %s436_s16 = scalar_lea.vmem %s8416_s13, %s8420_s26 }
  0x10   : > { %s6814_s17 = scalar_lea.vmem %s8403_s0, %s6682_s14 }
  0x11   : > { %v437_v6 = vld [vmem:[%s6814_s17] sm:$0xff]  ;;  %v438_v7 = vld [vmem:[%s6814_s17 + $0x8] sm:$0xff]  ;;  %v451_v9 = vld [vmem:[%s6814_s17 + $0x70] sm:$0xff] }
  0x12   : > { %5121 = vmatmul.mubr.msk.f32.vlgmr.msra.gmra.mrb[0].mxu0 %vm471_vm4, %v437_v6  ;;  %v450_v8 = vld [vmem:[%s6814_s17 + $0x68] sm:$0xff]  ;;  %v439_v10 = vld [vmem:[%s6814_s17 + $0x10] sm:$0xff]  ;;  %v452_v11 = vld [vmem:[%s6814_s17 + $0x78] sm:$0xff] }
  0x13   : > { %5123 = vmatprep.mubr.msk.f32.mxu0 %vm6705_vm3, %v6706_v5  ;;  %5160 = vmatmul.mubr.msk.f32.vlgmr.msra.gmra.mrb[0].mxu1 %vm471_vm4, %v450_v8  ;;  %v440_v12 = vld [vmem:[%s6814_s17 + $0x18] sm:$0xff]  ;;  %v453_v13 = vld [vmem:[%s6814_s17 + $0x80] sm:$0xff]  ;;  %v454_v15 = vld [vmem:[%s6814_s17 + $0x88] sm:$0xff] }
  0x14   : > { %5162 = vmatprep.mubr.msk.f32.mxu1 %vm6705_vm3, %v6706_v5  ;;  %v441_v14 = vld [vmem:[%s6814_s17 + $0x20] sm:$0xff]  ;;  %v442_v16 = vld [vmem:[%s6814_s17 + $0x28] sm:$0xff]  ;;  %v455_v17 = vld [vmem:[%s6814_s17 + $0x90] sm:$0xff] }
  0x15   : > { %v443_v18 = vld [vmem:[%s6814_s17 + $0x30] sm:$0xff]  ;;  %v456_v19 = vld [vmem:[%s6814_s17 + $0x98] sm:$0xff]  ;;  %v457_v21 = vld [vmem:[%s6814_s17 + $0xa0] sm:$0xff] }
  0x16   : > { %5124 = vmatmul.mubr.msk.f32.gmra.mrb[2].mxu0 %vm471_vm4, %v438_v7  ;;  %v444_v20 = vld [vmem:[%s6814_s17 + $0x38] sm:$0xff]  ;;  %v445_v22 = vld [vmem:[%s6814_s17 + $0x40] sm:$0xff]  ;;  %v458_v23 = vld [vmem:[%s6814_s17 + $0xa8] sm:$0xff] }
  0x17   : > { %5126 = vmatprep.mubr.msk.f32.mxu0 %vm6705_vm3, %v6706_v5  ;;  %5163 = vmatmul.mubr.msk.f32.gmra.mrb[2].mxu1 %vm471_vm4, %v451_v9  ;;  %v446_v24 = vld [vmem:[%s6814_s17 + $0x48] sm:$0xff]  ;;  %v459_v25 = vld [vmem:[%s6814_s17 + $0xb0] sm:$0xff]  ;;  %v460_v27 = vld [vmem:[%s6814_s17 + $0xb8] sm:$0xff] }
  0x18   : > { %5165 = vmatprep.mubr.msk.f32.mxu1 %vm6705_vm3, %v6706_v5  ;;  %v447_v26 = vld [vmem:[%s6814_s17 + $0x50] sm:$0xff]  ;;  %v448_v28 = vld [vmem:[%s6814_s17 + $0x58] sm:$0xff]  ;;  %v461_v29 = vld [vmem:[%s6814_s17 + $0xc0] sm:$0xf] }
  0x19   : > { %v449_v30 = vld [vmem:[%s6814_s17 + $0x60] sm:$0xff] }
  0x1a   : > { %5127 = vmatmul.mubr.msk.f32.gmra.mrb[4].mxu0 %vm471_vm4, %v439_v10 }
  0x1b   : > { %5129 = vmatprep.mubr.msk.f32.mxu0 %vm6705_vm3, %v6706_v5  ;;  %5166 = vmatmul.mubr.msk.f32.gmra.mrb[4].mxu1 %vm471_vm4, %v452_v11 }
  0x1c   : > { %5168 = vmatprep.mubr.msk.f32.mxu1 %vm6705_vm3, %v6706_v5 }
  0x1e   : > { %5130 = vmatmul.mubr.msk.f32.gmra.mrb[6].mxu0 %vm471_vm4, %v440_v12 }
  0x1f   : > { %5132 = vmatprep.mubr.msk.f32.mxu0 %vm6705_vm3, %v6706_v5  ;;  %5169 = vmatmul.mubr.msk.f32.gmra.mrb[6].mxu1 %vm471_vm4, %v453_v13 }
  0x20   : > { %5171 = vmatprep.mubr.msk.f32.mxu1 %vm6705_vm3, %v6706_v5 }
  0x22   : > { %5133 = vmatmul.mubr.msk.f32.gmra.mrb[8].mxu0 %vm471_vm4, %v441_v14 }
  0x23   : > { %5135 = vmatprep.mubr.msk.f32.mxu0 %vm6705_vm3, %v6706_v5  ;;  %5172 = vmatmul.mubr.msk.f32.gmra.mrb[8].mxu1 %vm471_vm4, %v454_v15 }
  0x24   : > { %5174 = vmatprep.mubr.msk.f32.mxu1 %vm6705_vm3, %v6706_v5 }
  0x26   : > { %5136 = vmatmul.mubr.msk.f32.gmra.mrb[10].mxu0 %vm471_vm4, %v442_v16 }
  0x27   : > { %5138 = vmatprep.mubr.msk.f32.mxu0 %vm6705_vm3, %v6706_v5  ;;  %5175 = vmatmul.mubr.msk.f32.gmra.mrb[10].mxu1 %vm471_vm4, %v455_v17 }
  0x28   : > { %5177 = vmatprep.mubr.msk.f32.mxu1 %vm6705_vm3, %v6706_v5 }
  0x2a   : > { %5139 = vmatmul.mubr.msk.f32.gmra.mrb[12].mxu0 %vm471_vm4, %v443_v18 }
  0x2b   : > { %5141 = vmatprep.mubr.msk.f32.mxu0 %vm6705_vm3, %v6706_v5  ;;  %5178 = vmatmul.mubr.msk.f32.gmra.mrb[12].mxu1 %vm471_vm4, %v456_v19 }
  0x2c   : > { %5180 = vmatprep.mubr.msk.f32.mxu1 %vm6705_vm3, %v6706_v5 }
  0x2e   : > { %5142 = vmatmul.mubr.msk.f32.gmra.mrb[14].mxu0 %vm471_vm4, %v444_v20 }
  0x2f   : > { %5144 = vmatprep.mubr.msk.f32.mxu0 %vm6705_vm3, %v6706_v5  ;;  %5181 = vmatmul.mubr.msk.f32.gmra.mrb[14].mxu1 %vm471_vm4, %v457_v21 }
  0x30   : > { %5183 = vmatprep.mubr.msk.f32.mxu1 %vm6705_vm3, %v6706_v5 }
  0x32   : > { %5145 = vmatmul.mubr.msk.f32.gmra.mrb[16].mxu0 %vm471_vm4, %v445_v22 }
  0x33   : > { %5147 = vmatprep.mubr.msk.f32.mxu0 %vm6705_vm3, %v6706_v5  ;;  %5184 = vmatmul.mubr.msk.f32.gmra.mrb[16].mxu1 %vm471_vm4, %v458_v23 }
  0x34   : > { %5186 = vmatprep.mubr.msk.f32.mxu1 %vm6705_vm3, %v6706_v5 }
  0x36   : > { %5148 = vmatmul.mubr.msk.f32.gmra.mrb[18].mxu0 %vm471_vm4, %v446_v24 }
  0x37   : > { %5150 = vmatprep.mubr.msk.f32.mxu0 %vm6705_vm3, %v6706_v5  ;;  %5187 = vmatmul.mubr.msk.f32.gmra.mrb[18].mxu1 %vm471_vm4, %v459_v25 }
  0x38   : > { %5189 = vmatprep.mubr.msk.f32.mxu1 %vm6705_vm3, %v6706_v5 }
  0x3a   : > { %5151 = vmatmul.mubr.msk.f32.gmra.mrb[20].mxu0 %vm471_vm4, %v447_v26 }
  0x3b   : > { %5153 = vmatprep.mubr.msk.f32.mxu0 %vm6705_vm3, %v6706_v5  ;;  %5190 = vmatmul.mubr.msk.f32.gmra.mrb[20].mxu1 %vm471_vm4, %v460_v27 }
  0x3c   : > { %5192 = vmatprep.mubr.msk.f32.mxu1 %vm6705_vm3, %v6706_v5 }
  0x3e   : > { %5154 = vmatmul.mubr.msk.f32.gmra.mrb[22].mxu0 %vm471_vm4, %v448_v28 }
  0x3f   : > { %5156 = vmatprep.mubr.msk.f32.mxu0 %vm6705_vm3, %v6706_v5  ;;  %5193 = vmatmul.mubr.msk.f32.gmra.mrb[22].mxu1 %vm471_vm4, %v461_v29 }
  0x40   : > { %4346 = vmatprep.mubr.msk.f32.mxu1 %vm780_vm5, %v767_v31 }
  0x42   : > { %5157 = vmatmul.mubr.msk.f32.gmra.mrb[24].mxu0 %vm471_vm4, %v449_v30 }
  0x43   : > { %4390 = vmatprep.mubr.msk.f32.mxu0 %vm780_vm5, %v4376_v36 }
  0xe5   : > { %v617_v33 = vpop.f32.mrb[0].mxu0 }
  0xe6   : > { %v5122_v34 = vpop.f32.mrb[1].mxu0  ;;  %v6921_v35 = vpop.f32.mrb[0].mxu1  ;;  %v618_v37 = vadd.f32 %v6919_v32, %v617_v33 }
  0xe7   : > { %v5161_v38 = vpop.f32.mrb[1].mxu1 }
  0xe8   : > { %v741_v43 = vmax.f32 %v618_v37, 0.0 }
  0xe9   : > { %v622_v39 = vpop.f32.mrb[2].mxu0 }
  0xea   : > { %v623_v40 = vadd.f32 %v6919_v32, %v622_v39  ;;  %v5125_v41 = vpop.f32.mrb[3].mxu0  ;;  %v687_v42 = vpop.f32.mrb[2].mxu1 }
  0xeb   : > { %v688_v45 = vadd.f32 %v6919_v32, %v687_v42  ;;  %v5164_v46 = vpop.f32.mrb[3].mxu1 }
  0xec   : > { %v742_v44 = vmax.f32 %v623_v40, 0.0 }
  0xed   : > { %v627_v47 = vpop.f32.mrb[4].mxu0  ;;  %v755_v52 = vmax.f32 %v688_v45, 0.0 }
  0xee   : > { %v6930_v48 = vpack.c.bf16 %v742_v44, %v741_v43  ;;  %v5128_v49 = vpop.f32.mrb[5].mxu0  ;;  %v692_v50 = vpop.f32.mrb[4].mxu1  ;;  %v628_v51 = vadd.f32 %v6919_v32, %v627_v47 }
  0xef   : > { %v693_v53 = vadd.f32 %v6919_v32, %v692_v50  ;;  %v5167_v54 = vpop.f32.mrb[5].mxu1 }
  0xf0   : > { %5962 = vmatpush1.bf16.msra.mxu1 %v6930_v48  ;;  %6034 = vmatpush1.bf16.msra.mxu0 %v6930_v48  ;;  %v743_v60 = vmax.f32 %v628_v51, 0.0 }
  0xf1   : > { %v632_v55 = vpop.f32.mrb[6].mxu0  ;;  %5963 = vmatprep.subr.bf16.mxu1 %v6703_v2  ;;  %6035 = vmatprep.subr.bf16.mxu0 %v6703_v2  ;;  %v756_v58 = vmax.f32 %v693_v53, 0.0 }
  0xf2   : > { %v633_v56 = vadd.f32 %v6919_v32, %v632_v55  ;;  %v5131_v57 = vpop.f32.mrb[7].mxu0  ;;  %v697_v59 = vpop.f32.mrb[6].mxu1 }
  0xf3   : > { %v6939_v62 = vpack.c.bf16 %v756_v58, %v755_v52  ;;  %v698_v63 = vadd.f32 %v6919_v32, %v697_v59  ;;  %v5170_v0 = vpop.f32.mrb[7].mxu1 }
  0xf4   : > { %v744_v61 = vmax.f32 %v633_v56, 0.0 }
  0xf5   : > { %v637_v1 = vpop.f32.mrb[8].mxu0  ;;  %v757_v9 = vmax.f32 %v698_v63, 0.0 }
  0xf6   : > { %v6942_v3 = vpack.c.bf16 %v744_v61, %v743_v60  ;;  %v5134_v6 = vpop.f32.mrb[9].mxu0  ;;  %v702_v7 = vpop.f32.mrb[8].mxu1  ;;  %v638_v8 = vadd.f32 %v6919_v32, %v637_v1 }
  0xf7   : > { %v703_v10 = vadd.f32 %v6919_v32, %v702_v7  ;;  %v5173_v11 = vpop.f32.mrb[9].mxu1 }
  0xf8   : > { %5965 = vmatpush1.bf16.msra.mxu1 %v6942_v3  ;;  %6037 = vmatpush1.bf16.msra.mxu0 %v6942_v3  ;;  %v745_v17 = vmax.f32 %v638_v8, 0.0 }
  0xf9   : > { %v642_v12 = vpop.f32.mrb[10].mxu0  ;;  %5966 = vmatprep.subr.bf16.mxu1 %v6703_v2  ;;  %6038 = vmatprep.subr.bf16.mxu0 %v6703_v2  ;;  %v758_v15 = vmax.f32 %v703_v10, 0.0 }
  0xfa   : > { %v643_v13 = vadd.f32 %v6919_v32, %v642_v12  ;;  %v5137_v14 = vpop.f32.mrb[11].mxu0  ;;  %v707_v16 = vpop.f32.mrb[10].mxu1 }
  0xfb   : > { %v6951_v19 = vpack.c.bf16 %v758_v15, %v757_v9  ;;  %v708_v20 = vadd.f32 %v6919_v32, %v707_v16  ;;  %v5176_v21 = vpop.f32.mrb[11].mxu1  ;;  %v683_v14 = vadd.f32 %v6919_v32, %v6921_v35 }
  0xfc   : > { %v746_v18 = vmax.f32 %v643_v13, 0.0 }
  0xfd   : > { %v647_v22 = vpop.f32.mrb[12].mxu0  ;;  %v759_v27 = vmax.f32 %v708_v20, 0.0 }
  0xfe   : > { %v6954_v23 = vpack.c.bf16 %v746_v18, %v745_v17  ;;  %v5140_v24 = vpop.f32.mrb[13].mxu0  ;;  %v712_v25 = vpop.f32.mrb[12].mxu1  ;;  %v648_v26 = vadd.f32 %v6919_v32, %v647_v22 }
  0xff   : > { %v713_v28 = vadd.f32 %v6919_v32, %v712_v25  ;;  %v5179_v29 = vpop.f32.mrb[13].mxu1 }
 0x100   : > { %5968 = vmatpush1.bf16.msra.mxu1 %v6954_v23  ;;  %6040 = vmatpush1.bf16.msra.mxu0 %v6954_v23  ;;  %v747_v37 = vmax.f32 %v648_v26, 0.0  ;;  %v766_v29 = vld [vmem:[%s8406_s3] sm:$0xff] }
 0x101   : > { %v652_v30 = vpop.f32.mrb[14].mxu0  ;;  %5969 = vmatprep.subr.bf16.mxu1 %v6703_v2  ;;  %6041 = vmatprep.subr.bf16.mxu0 %v6703_v2  ;;  %v760_v34 = vmax.f32 %v713_v28, 0.0 }
 0x102   : > { %v653_v31 = vadd.f32 %v6919_v32, %v652_v30  ;;  %v5143_v33 = vpop.f32.mrb[15].mxu0  ;;  %v717_v36 = vpop.f32.mrb[14].mxu1  ;;  %v769_v30 = vld [vmem:[%s8406_s3 + $0x18] sm:$0xff] }
 0x103   : > { %v6963_v39 = vpack.c.bf16 %v760_v34, %v759_v27  ;;  %v718_v40 = vadd.f32 %v6919_v32, %v717_v36  ;;  %v5182_v41 = vpop.f32.mrb[15].mxu1  ;;  %v754_v27 = vmax.f32 %v683_v14, 0.0  ;;  %v4378_v33 = vld [vmem:[%s8406_s3 + $0xf8] sm:$0xff]  ;;  %v768_v34 = vld [vmem:[%s8406_s3 + $0x10] sm:$0xff]  ;;  %v771_v36 = vld [vmem:[%s8406_s3 + $0x28] sm:$0xff] }
 0x104   : > { %v748_v38 = vmax.f32 %v653_v31, 0.0  ;;  %v4375_v31 = vld [vmem:[%s8406_s3 + $0xe0] sm:$0xff]  ;;  %v773_v41 = vld [vmem:[%s8406_s3 + $0x38] sm:$0xff]  ;;  %v4404_v14 = vld [vmem:[%s8406_s3 + $0x188] sm:$0xff] }
 0x105   : > { %v657_v42 = vpop.f32.mrb[16].mxu0  ;;  %v761_v47 = vmax.f32 %v718_v40, 0.0  ;;  %v770_v40 = vld [vmem:[%s8406_s3 + $0x20] sm:$0xff] }
 0x106   : > { %v6966_v43 = vpack.c.bf16 %v748_v38, %v747_v37  ;;  %v5146_v44 = vpop.f32.mrb[17].mxu0  ;;  %v722_v45 = vpop.f32.mrb[16].mxu1  ;;  %v658_v46 = vadd.f32 %v6919_v32, %v657_v42  ;;  %v4377_v37 = vld [vmem:[%s8406_s3 + $0xf0] sm:$0xff]  ;;  %v4380_v38 = vld [vmem:[%s8406_s3 + $0x108] sm:$0xff]  ;;  %v4379_v42 = vld [vmem:[%s8406_s3 + $0x100] sm:$0xff] }
 0x107   : > { %v723_v49 = vadd.f32 %v6919_v32, %v722_v45  ;;  %v5185_v50 = vpop.f32.mrb[17].mxu1  ;;  %v4382_v44 = vld [vmem:[%s8406_s3 + $0x118] sm:$0xff]  ;;  %v772_v45 = vld [vmem:[%s8406_s3 + $0x30] sm:$0xff] }
 0x108   : > { %5971 = vmatpush1.bf16.msra.mxu1 %v6966_v43  ;;  %6043 = vmatpush1.bf16.msra.mxu0 %v6966_v43  ;;  %v749_v56 = vmax.f32 %v658_v46, 0.0  ;;  %v775_v46 = vld [vmem:[%s8406_s3 + $0x48] sm:$0xff]  ;;  %v774_v50 = vld [vmem:[%s8406_s3 + $0x40] sm:$0xff] }
 0x109   : > { %v662_v51 = vpop.f32.mrb[18].mxu0  ;;  %5972 = vmatprep.subr.bf16.mxu1 %v6703_v2  ;;  %6044 = vmatprep.subr.bf16.mxu0 %v6703_v2  ;;  %v762_v54 = vmax.f32 %v723_v49, 0.0  ;;  %v4384_v49 = vld [vmem:[%s8406_s3 + $0x128] sm:$0xff] }
 0x10a   : > { %v663_v52 = vadd.f32 %v6919_v32, %v662_v51  ;;  %v5149_v53 = vpop.f32.mrb[19].mxu0  ;;  %v727_v55 = vpop.f32.mrb[18].mxu1  ;;  %v777_v51 = vld [vmem:[%s8406_s3 + $0x58] sm:$0xff] }
 0x10b   : > { %v6975_v58 = vpack.c.bf16 %v762_v54, %v761_v47  ;;  %v728_v59 = vadd.f32 %v6919_v32, %v727_v55  ;;  %v5188_v60 = vpop.f32.mrb[19].mxu1  ;;  %v4381_v47 = vld [vmem:[%s8406_s3 + $0x110] sm:$0xff]  ;;  %v4386_v53 = vld [vmem:[%s8406_s3 + $0x138] sm:$0xff]  ;;  %v779_v55 = vld [vmem:[%s8406_s3 + $0x68] sm:$0x1] }
 0x10c   : > { %v750_v57 = vmax.f32 %v663_v52, 0.0  ;;  %v4383_v52 = vld [vmem:[%s8406_s3 + $0x120] sm:$0xff]  ;;  %v776_v54 = vld [vmem:[%s8406_s3 + $0x50] sm:$0xff]  ;;  %v4354_v60 = vld [vmem:[%s8406_s3 + $0x78] sm:$0xff] }
 0x10d   : > { %v667_v61 = vpop.f32.mrb[20].mxu0  ;;  %v763_v7 = vmax.f32 %v728_v59, 0.0  ;;  %v778_v59 = vld [vmem:[%s8406_s3 + $0x60] sm:$0x1] }
 0x10e   : > { %v6978_v63 = vpack.c.bf16 %v750_v57, %v749_v56  ;;  %v5152_v0 = vpop.f32.mrb[21].mxu0  ;;  %v732_v1 = vpop.f32.mrb[20].mxu1  ;;  %v668_v6 = vadd.f32 %v6919_v32, %v667_v61  ;;  %v4385_v56 = vld [vmem:[%s8406_s3 + $0x130] sm:$0xff]  ;;  %v4388_v57 = vld [vmem:[%s8406_s3 + $0x148] sm:$0x1] }
 0x10f   : > { %v733_v8 = vadd.f32 %v6919_v32, %v732_v1  ;;  %v5191_v9 = vpop.f32.mrb[21].mxu1  ;;  %v4387_v61 = vld [vmem:[%s8406_s3 + $0x140] sm:$0x1]  ;;  %v4353_v0 = vld [vmem:[%s8406_s3 + $0x70] sm:$0xff]  ;;  %v4356_v1 = vld [vmem:[%s8406_s3 + $0x88] sm:$0xff] }
 0x110   : > { %5974 = vmatpush1.bf16.msra.mxu1 %v6978_v63  ;;  %6046 = vmatpush1.bf16.msra.mxu0 %v6978_v63  ;;  %v751_v16 = vmax.f32 %v668_v6, 0.0  ;;  %v4355_v6 = vld [vmem:[%s8406_s3 + $0x80] sm:$0xff]  ;;  %v4362_v9 = vld [vmem:[%s8406_s3 + $0xb8] sm:$0xff] }
 0x111   : > { %v672_v10 = vpop.f32.mrb[22].mxu0  ;;  %5975 = vmatprep.subr.bf16.mxu1 %v6703_v2  ;;  %6047 = vmatprep.subr.bf16.mxu0 %v6703_v2  ;;  %v764_v13 = vmax.f32 %v733_v8, 0.0  ;;  %v4360_v8 = vld [vmem:[%s8406_s3 + $0xa8] sm:$0xff] }
 0x112   : > { %v673_v11 = vadd.f32 %v6919_v32, %v672_v10  ;;  %v5155_v12 = vpop.f32.mrb[23].mxu0  ;;  %v737_v15 = vpop.f32.mrb[22].mxu1  ;;  %v4364_v10 = vld [vmem:[%s8406_s3 + $0xc8] sm:$0xff] }
 0x113   : > { %v6989_v18 = vpack.c.bf16 %v764_v13, %v763_v7  ;;  %v738_v20 = vadd.f32 %v6919_v32, %v737_v15  ;;  %v5194_v21 = vpop.f32.mrb[23].mxu1  ;;  %v4358_v7 = vld [vmem:[%s8406_s3 + $0x98] sm:$0xff]  ;;  %v4401_v13 = vld [vmem:[%s8406_s3 + $0x170] sm:$0xff]  ;;  %v4403_v15 = vld [vmem:[%s8406_s3 + $0x180] sm:$0xff] }
 0x114   : > { %v752_v17 = vmax.f32 %v673_v11, 0.0  ;;  %v4366_v11 = vld [vmem:[%s8406_s3 + $0xd8] sm:$0x1] }
 0x115   : > { %v677_v22 = vpop.f32.mrb[24].mxu0  ;;  %v4398_v12 = vld [vmem:[%s8406_s3 + $0x158] sm:$0xff] }
 0x116   : > { %v6992_v24 = vpack.c.bf16 %v752_v17, %v751_v16  ;;  %v678_v25 = vadd.f32 %v6919_v32, %v677_v22  ;;  %v5158_v26 = vpop.f32.mrb[25].mxu0  ;;  %v7021_v32 = vmax.f32 %v738_v20, 0.0  ;;  %v4406_v16 = vld [vmem:[%s8406_s3 + $0x198] sm:$0xff]  ;;  %v4405_v17 = vld [vmem:[%s8406_s3 + $0x190] sm:$0xff]  ;;  %v4407_v20 = vld [vmem:[%s8406_s3 + $0x1a0] sm:$0xff] }
 0x117   : > { %v4410_v21 = vld [vmem:[%s8406_s3 + $0x1b8] sm:$0x1]  ;;  %v4409_v22 = vld [vmem:[%s8406_s3 + $0x1b0] sm:$0x1]  ;;  %v1335_v26 = vld [vmem:[%s8409_s6] sm:$0xff] }
 0x118   : > { %v753_v28 = vmax.f32 %v678_v25, 0.0  ;;  %5977 = vmatpush1.bf16.msra.mxu1 %v6992_v24  ;;  %6049 = vmatpush1.bf16.msra.mxu0 %v6992_v24 }
 0x119   : > { %5978 = vmatprep.subr.bf16.mxu1 %v6703_v2  ;;  %6050 = vmatprep.subr.bf16.mxu0 %v6703_v2 }
 0x11a   : > { %v6999_v35 = vpack.c.bf16 %v754_v27, %v753_v28  ;;  %v4474_v28 = vld [vmem:[%s8409_s6 + $0x60] sm:$0xff] }
 0x11c   : > { %5980 = vmatpush1.bf16.msra.mxu1 %v6999_v35  ;;  %6052 = vmatpush1.bf16.msra.mxu0 %v6999_v35 }
 0x11d   : > { %5981 = vmatprep.subr.bf16.mxu1 %v6703_v2  ;;  %6053 = vmatprep.subr.bf16.mxu0 %v6703_v2 }
 0x120   : > { %5983 = vmatpush1.bf16.msra.mxu1 %v6939_v62  ;;  %6055 = vmatpush1.bf16.msra.mxu0 %v6939_v62 }
 0x121   : > { %5984 = vmatprep.subr.bf16.mxu1 %v6703_v2  ;;  %6056 = vmatprep.subr.bf16.mxu0 %v6703_v2 }
 0x124   : > { %5986 = vmatpush1.bf16.msra.mxu1 %v6951_v19  ;;  %6058 = vmatpush1.bf16.msra.mxu0 %v6951_v19 }
 0x125   : > { %5987 = vmatprep.subr.bf16.mxu1 %v6703_v2  ;;  %6059 = vmatprep.subr.bf16.mxu0 %v6703_v2 }
 0x128   : > { %5989 = vmatpush1.bf16.msra.mxu1 %v6963_v39  ;;  %6061 = vmatpush1.bf16.msra.mxu0 %v6963_v39 }
 0x129   : > { %5990 = vmatprep.subr.bf16.mxu1 %v6703_v2  ;;  %6062 = vmatprep.subr.bf16.mxu0 %v6703_v2 }
 0x12c   : > { %5992 = vmatpush1.bf16.msra.mxu1 %v6975_v58  ;;  %6064 = vmatpush1.bf16.msra.mxu0 %v6975_v58 }
 0x12d   : > { %5993 = vmatprep.subr.bf16.mxu1 %v6703_v2  ;;  %6065 = vmatprep.subr.bf16.mxu0 %v6703_v2 }
 0x130   : > { %5995 = vmatpush1.bf16.msra.mxu1 %v6989_v18  ;;  %6067 = vmatpush1.bf16.msra.mxu0 %v6989_v18 }
 0x131   : > { %854 = vmatprep.subr.mxu1 %v6706_v5  ;;  %1133 = vmatprep.subr.mxu0 %v6706_v5 }
 0x134   : > { %4345 = vmatpush1.msk.msra.mxu1 %vm802_vm6, %v7021_v32  ;;  %4389 = vmatpush1.msk.msra.mxu0 %vm802_vm6, %v7021_v32 }
 0x135   : > { %871 = vmatmul.mubr.f32.vlgmr.msra.gmra.mrb[24].mxu1 %v766_v29  ;;  %5996 = vmatprep.subr.bf16.mxu1 %v6703_v2 }
 0x136   : > { %5998 = vmatpush1.bf16.msra.mxu1 %v6930_v48  ;;  %4347 = vmatprep.mubr.msk.f32.mxu1 %vm780_vm5, %v769_v30 }
 0x137   : > { %5999 = vmatprep.subr.bf16.mxu1 %v6703_v2  ;;  %1150 = vmatmul.mubr.f32.vlgmr.msra.gmra.mrb[26].mxu0 %v4375_v31 }
 0x138   : > { %4391 = vmatprep.mubr.msk.f32.mxu0 %vm780_vm5, %v4378_v33 }
 0x139   : > { %876 = vmatmul.mubr.f32.gmra.mrb[26].mxu1 %v768_v34 }
 0x13a   : > { %6001 = vmatpush1.bf16.msra.mxu1 %v6942_v3  ;;  %4348 = vmatprep.mubr.msk.f32.mxu1 %vm780_vm5, %v771_v36 }
 0x13b   : > { %6002 = vmatprep.subr.bf16.mxu1 %v6703_v2  ;;  %1155 = vmatmul.mubr.f32.gmra.mrb[28].mxu0 %v4377_v37 }
 0x13c   : > { %4392 = vmatprep.mubr.msk.f32.mxu0 %vm780_vm5, %v4380_v38 }
 0x13d   : > { %881 = vmatmul.mubr.f32.gmra.mrb[28].mxu1 %v770_v40 }
 0x13e   : > { %6004 = vmatpush1.bf16.msra.mxu1 %v6954_v23  ;;  %4349 = vmatprep.mubr.msk.f32.mxu1 %vm780_vm5, %v773_v41 }
 0x13f   : > { %6005 = vmatprep.subr.bf16.mxu1 %v6703_v2  ;;  %1160 = vmatmul.mubr.f32.gmra.mrb[30].mxu0 %v4379_v42 }
 0x140   : > { %4393 = vmatprep.mubr.msk.f32.mxu0 %vm780_vm5, %v4382_v44 }
 0x141   : > { %886 = vmatmul.mubr.f32.gmra.mrb[30].mxu1 %v772_v45 }
 0x142   : > { %6007 = vmatpush1.bf16.msra.mxu1 %v6966_v43  ;;  %4350 = vmatprep.mubr.msk.f32.mxu1 %vm780_vm5, %v775_v46 }
 0x143   : > { %6008 = vmatprep.subr.bf16.mxu1 %v6703_v2  ;;  %1165 = vmatmul.mubr.f32.gmra.mrb[32].mxu0 %v4381_v47 }
 0x144   : > { %4394 = vmatprep.mubr.msk.f32.mxu0 %vm780_vm5, %v4384_v49 }
 0x145   : > { %891 = vmatmul.mubr.f32.gmra.mrb[32].mxu1 %v774_v50 }
 0x146   : > { %6010 = vmatpush1.bf16.msra.mxu1 %v6978_v63  ;;  %4351 = vmatprep.mubr.msk.f32.mxu1 %vm780_vm5, %v777_v51 }
 0x147   : > { %6011 = vmatprep.subr.bf16.mxu1 %v6703_v2  ;;  %1170 = vmatmul.mubr.f32.gmra.mrb[34].mxu0 %v4383_v52 }
 0x148   : > { %4395 = vmatprep.mubr.msk.f32.mxu0 %vm780_vm5, %v4386_v53 }
 0x149   : > { %896 = vmatmul.mubr.f32.gmra.mrb[34].mxu1 %v776_v54 }
 0x14a   : > { %6013 = vmatpush1.bf16.msra.mxu1 %v6992_v24  ;;  %4352 = vmatprep.mubr.msk.f32.mxu1 %vm780_vm5, %v779_v55 }
 0x14b   : > { %6014 = vmatprep.subr.bf16.mxu1 %v6703_v2  ;;  %1175 = vmatmul.mubr.f32.gmra.mrb[36].mxu0 %v4385_v56 }
 0x14c   : > { %4396 = vmatprep.mubr.msk.f32.mxu0 %vm780_vm5, %v4388_v57 }
 0x14d   : > { %901 = vmatmul.mubr.f32.gmra.mrb[36].mxu1 %v778_v59 }
 0x14e   : > { %6016 = vmatpush1.bf16.msra.mxu1 %v6999_v35  ;;  %4368 = vmatprep.mubr.msk.f32.mxu1 %vm780_vm5, %v4354_v60 }
 0x14f   : > { %6017 = vmatprep.subr.bf16.mxu1 %v6703_v2  ;;  %1180 = vmatmul.mubr.f32.gmra.mrb[38].mxu0 %v4387_v61 }
 0x150   : > { %5209 = vmatprep.mubr.msk.f32.mxu0 %vm1339_vm7, %v1335_v26 }
 0x152   : > { %6019 = vmatpush1.bf16.msra.mxu1 %v6939_v62 }
 0x153   : > { %6020 = vmatprep.subr.bf16.mxu1 %v6703_v2 }
 0x156   : > { %6022 = vmatpush1.bf16.msra.mxu1 %v6951_v19 }
 0x157   : > { %6023 = vmatprep.subr.bf16.mxu1 %v6703_v2 }
 0x15a   : > { %6025 = vmatpush1.bf16.msra.mxu1 %v6963_v39 }
 0x15b   : > { %6026 = vmatprep.subr.bf16.mxu1 %v6703_v2 }
 0x15e   : > { %6028 = vmatpush1.bf16.msra.mxu1 %v6975_v58 }
 0x15f   : > { %6029 = vmatprep.subr.bf16.mxu1 %v6703_v2 }
 0x162   : > { %6031 = vmatpush1.bf16.msra.mxu1 %v6989_v18 }
 0x163   : > { %990 = vmatprep.subr.mxu1 %v6706_v5 }
 0x166   : > { %4367 = vmatpush1.msk.msra.mxu1 %vm802_vm6, %v7021_v32 }
 0x167   : > { %1007 = vmatmul.mubr.f32.vlgmr.msra.gmra.mrb[38].mxu1 %v4353_v0  ;;  %6068 = vmatprep.subr.bf16.mxu1 %v6703_v2 }
 0x168   : > { %6070 = vmatpush1.bf16.msra.mxu1 %v6930_v48  ;;  %4369 = vmatprep.mubr.msk.f32.mxu1 %vm780_vm5, %v4356_v1  ;;  %v4357_v48 = vld [vmem:[%s8406_s3 + $0x90] sm:$0xff] }
 0x169   : > { %6071 = vmatprep.subr.bf16.mxu1 %v6703_v2 }
 0x16b   : > { %1012 = vmatmul.mubr.f32.gmra.mrb[40].mxu1 %v4355_v6 }
 0x16c   : > { %6073 = vmatpush1.bf16.msra.mxu1 %v6942_v3  ;;  %4370 = vmatprep.mubr.msk.f32.mxu1 %vm780_vm5, %v4358_v7  ;;  %v4359_v3 = vld [vmem:[%s8406_s3 + $0xa0] sm:$0xff] }
 0x16d   : > { %6074 = vmatprep.subr.bf16.mxu1 %v6703_v2 }
 0x16f   : > { %1017 = vmatmul.mubr.f32.gmra.mrb[42].mxu1 %v4357_v48 }
 0x170   : > { %6076 = vmatpush1.bf16.msra.mxu1 %v6954_v23  ;;  %4371 = vmatprep.mubr.msk.f32.mxu1 %vm780_vm5, %v4360_v8  ;;  %v4361_v23 = vld [vmem:[%s8406_s3 + $0xb0] sm:$0xff] }
 0x171   : > { %6077 = vmatprep.subr.bf16.mxu1 %v6703_v2 }
 0x173   : > { %1022 = vmatmul.mubr.f32.gmra.mrb[44].mxu1 %v4359_v3 }
 0x174   : > { %6079 = vmatpush1.bf16.msra.mxu1 %v6966_v43  ;;  %4372 = vmatprep.mubr.msk.f32.mxu1 %vm780_vm5, %v4362_v9  ;;  %v4363_v43 = vld [vmem:[%s8406_s3 + $0xc0] sm:$0xff] }
 0x175   : > { %6080 = vmatprep.subr.bf16.mxu1 %v6703_v2 }
 0x177   : > { %1027 = vmatmul.mubr.f32.gmra.mrb[46].mxu1 %v4361_v23 }
 0x178   : > { %6082 = vmatpush1.bf16.msra.mxu1 %v6978_v63  ;;  %4373 = vmatprep.mubr.msk.f32.mxu1 %vm780_vm5, %v4364_v10  ;;  %v4365_v63 = vld [vmem:[%s8406_s3 + $0xd0] sm:$0x1] }
 0x179   : > { %6083 = vmatprep.subr.bf16.mxu1 %v6703_v2 }
 0x17b   : > { %1032 = vmatmul.mubr.f32.gmra.mrb[48].mxu1 %v4363_v43 }
 0x17c   : > { %6085 = vmatpush1.bf16.msra.mxu1 %v6992_v24  ;;  %4374 = vmatprep.mubr.msk.f32.mxu1 %vm780_vm5, %v4366_v11 }
 0x17d   : > { %6086 = vmatprep.subr.bf16.mxu1 %v6703_v2 }
 0x17f   : > { %1037 = vmatmul.mubr.f32.gmra.mrb[50].mxu1 %v4365_v63 }
 0x180   : > { %6088 = vmatpush1.bf16.msra.mxu1 %v6999_v35  ;;  %4412 = vmatprep.mubr.msk.f32.mxu1 %vm780_vm5, %v4398_v12 }
 0x181   : > { %6089 = vmatprep.subr.bf16.mxu1 %v6703_v2 }
 0x184   : > { %6091 = vmatpush1.bf16.msra.mxu1 %v6939_v62  ;;  %v4397_v62 = vld [vmem:[%s8406_s3 + $0x150] sm:$0xff] }
 0x185   : > { %6092 = vmatprep.subr.bf16.mxu1 %v6703_v2 }
 0x188   : > { %6094 = vmatpush1.bf16.msra.mxu1 %v6951_v19  ;;  %v4400_v19 = vld [vmem:[%s8406_s3 + $0x168] sm:$0xff] }
 0x189   : > { %6095 = vmatprep.subr.bf16.mxu1 %v6703_v2 }
 0x18c   : > { %6097 = vmatpush1.bf16.msra.mxu1 %v6963_v39  ;;  %v4399_v39 = vld [vmem:[%s8406_s3 + $0x160] sm:$0xff] }
 0x18d   : > { %6098 = vmatprep.subr.bf16.mxu1 %v6703_v2 }
 0x190   : > { %6100 = vmatpush1.bf16.msra.mxu1 %v6975_v58  ;;  %v4402_v58 = vld [vmem:[%s8406_s3 + $0x178] sm:$0xff] }
 0x191   : > { %6101 = vmatprep.subr.bf16.mxu1 %v6703_v2 }
 0x194   : > { %6103 = vmatpush1.bf16.msra.mxu1 %v6989_v18  ;;  %v4408_v18 = vld [vmem:[%s8406_s3 + $0x1a8] sm:$0xff] }
 0x195   : > { %1276 = vmatprep.subr.mxu1 %v6706_v5 }
 0x198   : > { %4411 = vmatpush1.msk.msra.mxu1 %vm802_vm6, %v7021_v32 }
 0x199   : > { %1293 = vmatmul.mubr.f32.vlgmr.msra.gmra.mrb[52].mxu1 %v4397_v62 }
 0x19a   : > { %4413 = vmatprep.mubr.msk.f32.mxu1 %vm780_vm5, %v4400_v19 }
 0x19d   : > { %1298 = vmatmul.mubr.f32.gmra.mrb[54].mxu1 %v4399_v39 }
 0x19e   : > { %4414 = vmatprep.mubr.msk.f32.mxu1 %vm780_vm5, %v4402_v58 }
 0x1a1   : > { %1303 = vmatmul.mubr.f32.gmra.mrb[56].mxu1 %v4401_v13 }
 0x1a2   : > { %4415 = vmatprep.mubr.msk.f32.mxu1 %vm780_vm5, %v4404_v14 }
 0x1a5   : > { %1308 = vmatmul.mubr.f32.gmra.mrb[58].mxu1 %v4403_v15 }
 0x1a6   : > { %4416 = vmatprep.mubr.msk.f32.mxu1 %vm780_vm5, %v4406_v16 }
 0x1a9   : > { %1313 = vmatmul.mubr.f32.gmra.mrb[60].mxu1 %v4405_v17 }
 0x1aa   : > { %4417 = vmatprep.mubr.msk.f32.mxu1 %vm780_vm5, %v4408_v18 }
 0x1ad   : > { %1318 = vmatmul.mubr.f32.gmra.mrb[62].mxu1 %v4407_v20 }
 0x1ae   : > { %4418 = vmatprep.mubr.msk.f32.mxu1 %vm780_vm5, %v4410_v21 }
 0x1b1   : > { %1323 = vmatmul.mubr.f32.gmra.mrb[64].mxu1 %v4409_v22 }
 0x1b2   : > { %5383 = vmatprep.mubr.msk.f32.mxu1 %vm1339_vm7, %v4474_v28 }
 0x208   : > { %v872_v24 = vpop.f32.mrb[24].mxu1 }
 0x209   : > { %v874_v25 = vpop.f32.mrb[25].mxu1 }
 0x20a   : > { %v1151_v27 = vpop.f32.mrb[26].mxu0 }
 0x20b   : > { %v1153_v35 = vpop.f32.mrb[27].mxu0 }
 0x20c   : > { %v877_v32 = vpop.f32.mrb[26].mxu1 }
 0x20d   : > { %v879_v29 = vpop.f32.mrb[27].mxu1 }
 0x20e   : > { %v1156_v30 = vpop.f32.mrb[28].mxu0 }
 0x20f   : > { %v1158_v31 = vpop.f32.mrb[29].mxu0 }
 0x210   : > { %v882_v33 = vpop.f32.mrb[28].mxu1 }
 0x211   : > { %v884_v34 = vpop.f32.mrb[29].mxu1 }
 0x212   : > { %v1161_v36 = vpop.f32.mrb[30].mxu0 }
 0x213   : > { %v1163_v37 = vpop.f32.mrb[31].mxu0 }
 0x214   : > { %v887_v38 = vpop.f32.mrb[30].mxu1 }
 0x215   : > { %v889_v40 = vpop.f32.mrb[31].mxu1 }
 0x216   : > { %v1166_v41 = vpop.f32.mrb[32].mxu0 }
 0x217   : > { %v1168_v42 = vpop.f32.mrb[33].mxu0 }
 0x218   : > { %v892_v44 = vpop.f32.mrb[32].mxu1 }
 0x219   : > { %v894_v45 = vpop.f32.mrb[33].mxu1 }
 0x21a   : > { %v1171_v46 = vpop.f32.mrb[34].mxu0 }
 0x21b   : > { %v1173_v47 = vpop.f32.mrb[35].mxu0 }
 0x21c   : > { %v897_v49 = vpop.f32.mrb[34].mxu1  ;;  %v1336_v47 = vld [vmem:[%s8409_s6 + $0x8] sm:$0xff] }
 0x21d   : > { %v899_v50 = vpop.f32.mrb[35].mxu1 }
 0x21e   : > { %v1176_v51 = vpop.f32.mrb[36].mxu0  ;;  %v1337_v50 = vld [vmem:[%s8409_s6 + $0x10] sm:$0xff] }
 0x21f   : > { %v1178_v52 = vpop.f32.mrb[37].mxu0 }
 0x220   : > { %v902_v53 = vpop.f32.mrb[36].mxu1  ;;  %v1338_v52 = vld [vmem:[%s8409_s6 + $0x18] sm:$0x1] }
 0x221   : > { %v904_v54 = vpop.f32.mrb[37].mxu1 }
 0x222   : > { %v1181_v55 = vpop.f32.mrb[38].mxu0  ;;  %v4424_v54 = vld [vmem:[%s8409_s6 + $0x20] sm:$0xff] }
 0x223   : > { %v1183_v56 = vpop.f32.mrb[39].mxu0 }
 0x224   : > { %v4433_v56 = vld [vmem:[%s8407_s4 + $0x80] sm:$0xff] }
 0x23a   : > { %v1008_v57 = vpop.f32.mrb[38].mxu1 }
 0x23b   : > { %v1042_v59 = vmax.f32 %v872_v24, %v1008_v57  ;;  %v1010_v60 = vpop.f32.mrb[39].mxu1  ;;  %v4434_v57 = vld [vmem:[%s8407_s4 + $0x88] sm:$0xff] }
 0x23c   : > { %v4500_v60 = vld [vmem:[%s8409_s6 + $0x88] sm:$0xff] }
 0x23d   : > { %v1185_v61 = vmax.f32 %v1042_v59, %v1151_v27  ;;  %v4425_v59 = vld [vmem:[%s8409_s6 + $0x28] sm:$0xff] }
 0x23e   : > { %v1013_v0 = vpop.f32.mrb[40].mxu1 }
 0x23f   : > { %v1043_v1 = vmax.f32 %v877_v32, %v1013_v0  ;;  %v1015_v6 = vpop.f32.mrb[41].mxu1  ;;  %v4501_v0 = vld [vmem:[%s8409_s6 + $0x90] sm:$0xff] }
 0x240   : > { %v4435_v6 = vld [vmem:[%s8407_s4 + $0x90] sm:$0xff] }
 0x241   : > { %v1186_v7 = vmax.f32 %v1043_v1, %v1156_v30  ;;  %v6128_v1 = vpack.c.bf16 %v4434_v57, %v4433_v56  ;;  %v1444_v57 = vld [vmem:[%s8407_s4 + $0x20] sm:$0xff] }
 0x242   : > { %v1018_v48 = vpop.f32.mrb[42].mxu1 }
 0x243   : > { %v1044_v8 = vmax.f32 %v882_v33, %v1018_v48  ;;  %v1020_v3 = vpop.f32.mrb[43].mxu1  ;;  %v4427_v48 = vld [vmem:[%s8409_s6 + $0x38] sm:$0x1] }
 0x244   : > { %v4524_v3 = vld [vmem:[%s8409_s6 + $0xa0] sm:$0xff] }
 0x245   : > { %v1187_v9 = vmax.f32 %v1044_v8, %v1161_v36  ;;  %v4502_v8 = vld [vmem:[%s8409_s6 + $0x98] sm:$0x1] }
 0x246   : > { %v1023_v23 = vpop.f32.mrb[44].mxu1 }
 0x247   : > { %v1045_v10 = vmax.f32 %v887_v38, %v1023_v23  ;;  %v1025_v43 = vpop.f32.mrb[45].mxu1  ;;  %v4437_v23 = vld [vmem:[%s8407_s4 + $0xa0] sm:$0xff] }
 0x249   : > { %v1188_v11 = vmax.f32 %v1045_v10, %v1166_v41  ;;  %v4438_v10 = vld [vmem:[%s8407_s4 + $0xa8] sm:$0xff] }
 0x24a   : > { %v1028_v63 = vpop.f32.mrb[46].mxu1  ;;  %v6136_v43 = vpack.c.bf16 %v4438_v10, %v4437_v23  ;;  %v1451_v23 = vld [vmem:[%s8407_s4 + $0x58] sm:$0xff] }
 0x24b   : > { %v1046_v12 = vmax.f32 %v892_v44, %v1028_v63  ;;  %v1030_v62 = vpop.f32.mrb[47].mxu1  ;;  %v4440_v63 = vld [vmem:[%s8407_s4 + $0xb8] sm:$0xff] }
 0x24c   : > { %v4441_v62 = vld [vmem:[%s8407_s4 + $0xc0] sm:$0xff] }
 0x24d   : > { %v1189_v19 = vmax.f32 %v1046_v12, %v1171_v46 }
 0x24e   : > { %v1033_v39 = vpop.f32.mrb[48].mxu1 }
 0x24f   : > { %v1047_v58 = vmax.f32 %v897_v49, %v1033_v39  ;;  %v1035_v13 = vpop.f32.mrb[49].mxu1  ;;  %v4475_v49 = vld [vmem:[%s8409_s6 + $0x68] sm:$0xff] }
 0x250   : > { %v4525_v39 = vld [vmem:[%s8409_s6 + $0xa8] sm:$0xff] }
 0x251   : > { %v1190_v14 = vmax.f32 %v1047_v58, %v1176_v51  ;;  %v4476_v51 = vld [vmem:[%s8409_s6 + $0x70] sm:$0xff] }
 0x252   : > { %v1038_v15 = vpop.f32.mrb[50].mxu1  ;;  %v4526_v58 = vld [vmem:[%s8409_s6 + $0xb0] sm:$0xff] }
 0x253   : > { %v1048_v16 = vmax.f32 %v902_v53, %v1038_v15  ;;  %v1040_v17 = vpop.f32.mrb[51].mxu1  ;;  %v4477_v53 = vld [vmem:[%s8409_s6 + $0x78] sm:$0x1] }
 0x254   : > { %v4444_v15 = vld [vmem:[%s8407_s4 + $0xd8] sm:$0xff]  ;;  %v4549_v17 = vld [vmem:[%s8409_s6 + $0xc0] sm:$0xff] }
 0x255   : > { %v1191_v18 = vmax.f32 %v1048_v16, %v1181_v55  ;;  %v4499_v55 = vld [vmem:[%s8409_s6 + $0x80] sm:$0xff]  ;;  %v4527_v16 = vld [vmem:[%s8409_s6 + $0xb8] sm:$0x1] }
 0x26c   : > { %v1294_v20 = vpop.f32.mrb[52].mxu1 }
 0x26d   : > { %v1328_v21 = vmax.f32 %v1185_v61, %v1294_v20  ;;  %v1296_v22 = vpop.f32.mrb[53].mxu1  ;;  %v4426_v61 = vld [vmem:[%s8409_s6 + $0x30] sm:$0xff]  ;;  %v4550_v20 = vld [vmem:[%s8409_s6 + $0xc8] sm:$0xff] }
 0x26e   : > { %v4552_v22 = vld [vmem:[%s8409_s6 + $0xd8] sm:$0x1] }
 0x270   : > { %v1299_v24 = vpop.f32.mrb[54].mxu1 }
 0x271   : > { %v1329_v25 = vmax.f32 %v1186_v7, %v1299_v24  ;;  %v1301_v26 = vpop.f32.mrb[55].mxu1  ;;  %v4436_v7 = vld [vmem:[%s8407_s4 + $0x98] sm:$0xff]  ;;  %v4574_v24 = vld [vmem:[%s8409_s6 + $0xe0] sm:$0xff] }
 0x272   : > { %v4445_v26 = vld [vmem:[%s8407_s4 + $0xe0] sm:$0xff] }
 0x273   : > { %v7281_v27 = vpack.c.bf16 %v1329_v25, %v1328_v21  ;;  %v4551_v21 = vld [vmem:[%s8409_s6 + $0xd0] sm:$0xff]  ;;  %v4575_v25 = vld [vmem:[%s8409_s6 + $0xe8] sm:$0xff] }
 0x274   : > { %v1304_v28 = vpop.f32.mrb[56].mxu1 }
 0x275   : > { %v1330_v35 = vmax.f32 %v1187_v9, %v1304_v28  ;;  %v1306_v32 = vpop.f32.mrb[57].mxu1  ;;  %6105 = vmatprep.subr.bf16.mxu0 %v7281_v27  ;;  %6237 = vmatprep.subr.bf16.mxu1 %v7281_v27  ;;  %v6132_v9 = vpack.c.bf16 %v4436_v7, %v4435_v6  ;;  %v4446_v28 = vld [vmem:[%s8407_s4 + $0xe8] sm:$0xff]  ;;  %v1447_v6 = vld [vmem:[%s8407_s4 + $0x38] sm:$0xff] }
 0x276   : > { %6107 = vmatpush3.bf16.msra.mxu0 %v7281_v27  ;;  %6239 = vmatpush3.bf16.msra.mxu1 %v7281_v27  ;;  %v4447_v32 = vld [vmem:[%s8407_s4 + $0xf0] sm:$0xff] }
 0x278   : > { %v1309_v29 = vpop.f32.mrb[58].mxu1 }
 0x279   : > { %v1331_v30 = vmax.f32 %v1188_v11, %v1309_v29  ;;  %v1311_v31 = vpop.f32.mrb[59].mxu1  ;;  %v4439_v11 = vld [vmem:[%s8407_s4 + $0xb0] sm:$0xff]  ;;  %v4448_v29 = vld [vmem:[%s8407_s4 + $0xf8] sm:$0xff] }
 0x27a   : > { %v6140_v12 = vpack.c.bf16 %v4440_v63, %v4439_v11  ;;  %v1440_v31 = vld [vmem:[%s8407_s4] sm:$0xff]  ;;  %v1453_v11 = vld [vmem:[%s8407_s4 + $0x68] sm:$0xff] }
 0x27b   : > { %v7287_v33 = vpack.c.bf16 %v1331_v30, %v1330_v35  ;;  %v6152_v35 = vpack.c.bf16 %v4446_v28, %v4445_v26  ;;  %v6156_v30 = vpack.c.bf16 %v4448_v29, %v4447_v32  ;;  %v4467_v26 = vld [vmem:[%s8407_s4 + $0x148] sm:$0xff]  ;;  %v4469_v32 = vld [vmem:[%s8407_s4 + $0x158] sm:$0xff] }
 0x27c   : > { %v1314_v34 = vpop.f32.mrb[60].mxu1 }
 0x27d   : > { %v1332_v36 = vmax.f32 %v1189_v19, %v1314_v34  ;;  %v1316_v37 = vpop.f32.mrb[61].mxu1  ;;  %6109 = vmatprep.subr.bf16.mxu0 %v7287_v33  ;;  %6241 = vmatprep.subr.bf16.mxu1 %v7287_v33  ;;  %v4442_v19 = vld [vmem:[%s8407_s4 + $0xc8] sm:$0xff] }
 0x27e   : > { %6111 = vmatpush3.bf16.msra.mxu0 %v7287_v33  ;;  %6243 = vmatpush3.bf16.msra.mxu1 %v7287_v33  ;;  %v6144_v13 = vpack.c.bf16 %v4442_v19, %v4441_v62  ;;  %v1441_v34 = vld [vmem:[%s8407_s4 + $0x8] sm:$0xff]  ;;  %v4576_v37 = vld [vmem:[%s8409_s6 + $0xf0] sm:$0xff]  ;;  %v1455_v62 = vld [vmem:[%s8407_s4 + $0x78] sm:$0xff] }
 0x280   : > { %v1319_v38 = vpop.f32.mrb[62].mxu1 }
 0x281   : > { %v1333_v40 = vmax.f32 %v1190_v14, %v1319_v38  ;;  %v1321_v41 = vpop.f32.mrb[63].mxu1  ;;  %v4443_v14 = vld [vmem:[%s8407_s4 + $0xd0] sm:$0xff]  ;;  %v4577_v38 = vld [vmem:[%s8409_s6 + $0xf8] sm:$0x1] }
 0x282   : > { %v4600_v41 = vld [vmem:[%s8409_s6 + $0x108] sm:$0xff] }
 0x283   : > { %v7293_v42 = vpack.c.bf16 %v1333_v40, %v1332_v36  ;;  %v6160_v36 = vpack.c.bf16 %v1441_v34, %v1440_v31  ;;  %v4599_v40 = vld [vmem:[%s8409_s6 + $0x100] sm:$0xff]  ;;  %v4471_v31 = vld [vmem:[%s8407_s4 + $0x168] sm:$0xff] }
 0x284   : > { %v1324_v44 = vpop.f32.mrb[64].mxu1 }
 0x285   : > { %v7295_v45 = vmax.f32 %v1191_v18, %v1324_v44  ;;  %6113 = vmatprep.subr.bf16.mxu0 %v7293_v42  ;;  %6245 = vmatprep.subr.bf16.mxu1 %v7293_v42  ;;  %v1326_v46 = vpop.f32.mrb[65].mxu1  ;;  %v6148_v18 = vpack.c.bf16 %v4444_v15, %v4443_v14  ;;  %v4601_v44 = vld [vmem:[%s8409_s6 + $0x110] sm:$0xff]  ;;  %v4450_v15 = vld [vmem:[%s8409_s6 + $0x48] sm:$0xff] }
 0x286   : > { %6115 = vmatpush3.bf16.msra.mxu0 %v7293_v42  ;;  %6247 = vmatpush3.bf16.msra.mxu1 %v7293_v42  ;;  %v4602_v46 = vld [vmem:[%s8409_s6 + $0x118] sm:$0x1] }
 0x287   : > { %5207 = vmatprep.subr.msk.mxu0 %vm547_vm0, %v7295_v45  ;;  %5381 = vmatprep.subr.msk.mxu1 %vm547_vm0, %v7295_v45 }
 0x28a   : > { %5208 = vmatpush3.msk.msra.mxu0 %vm547_vm0, %v7295_v45  ;;  %5382 = vmatpush3.msk.msra.mxu1 %vm547_vm0, %v7295_v45 }
 0x28b   : > { %6117 = vmatprep.subr.bf16.mxu0 %v7281_v27  ;;  %6281 = vmatprep.subr.bf16.mxu1 %v7281_v27 }
 0x28c   : > { %5210 = vmatmul.mubr.msk.f32.vlgmr.msra.gmra.mrb[40].mxu0 %vm1339_vm7, %v1336_v47  ;;  %5384 = vmatmul.mubr.msk.f32.vlgmr.msra.gmra.mrb[66].mxu1 %vm1339_vm7, %v4475_v49 }
 0x28d   : > { %6119 = vmatpush3.bf16.msra.mxu0 %v7281_v27  ;;  %6283 = vmatpush3.bf16.msra.mxu1 %v7281_v27 }
 0x28e   : > { %6121 = vmatprep.subr.bf16.mxu0 %v7287_v33  ;;  %6285 = vmatprep.subr.bf16.mxu1 %v7287_v33 }
 0x28f   : > { %5212 = vmatprep.mubr.msk.f32.mxu0 %vm1339_vm7, %v1337_v50  ;;  %5386 = vmatprep.mubr.msk.f32.mxu1 %vm1339_vm7, %v4476_v51 }
 0x290   : > { %5213 = vmatmul.mubr.msk.f32.gmra.mrb[42].mxu0 %vm1339_vm7, %v1338_v52  ;;  %5387 = vmatmul.mubr.msk.f32.gmra.mrb[68].mxu1 %vm1339_vm7, %v4477_v53  ;;  %v1442_v52 = vld [vmem:[%s8407_s4 + $0x10] sm:$0xff]  ;;  %v1443_v53 = vld [vmem:[%s8407_s4 + $0x18] sm:$0xff] }
 0x291   : > { %6123 = vmatpush3.bf16.msra.mxu0 %v7287_v33  ;;  %6287 = vmatpush3.bf16.msra.mxu1 %v7287_v33  ;;  %v6164_v56 = vpack.c.bf16 %v1443_v53, %v1442_v52 }
 0x292   : > { %6125 = vmatprep.subr.bf16.mxu0 %v7293_v42  ;;  %6289 = vmatprep.subr.bf16.mxu1 %v7293_v42 }
 0x293   : > { %5229 = vmatprep.mubr.msk.f32.mxu0 %vm1339_vm7, %v4424_v54  ;;  %5441 = vmatprep.mubr.msk.f32.mxu1 %vm1339_vm7, %v4499_v55 }
 0x295   : > { %6127 = vmatpush3.bf16.msra.mxu0 %v7293_v42  ;;  %6291 = vmatpush3.bf16.msra.mxu1 %v7293_v42 }
 0x296   : > { %5227 = vmatprep.subr.msk.mxu0 %vm547_vm0, %v7295_v45  ;;  %5439 = vmatprep.subr.msk.mxu1 %vm547_vm0, %v7295_v45 }
 0x299   : > { %5228 = vmatpush3.msk.msra.mxu0 %vm547_vm0, %v7295_v45  ;;  %5440 = vmatpush3.msk.msra.mxu1 %vm547_vm0, %v7295_v45 }
 0x29a   : > { %5230 = vmatmul.mubr.msk.f32.vlgmr.msra.gmra.mrb[44].mxu0 %vm1339_vm7, %v4425_v59  ;;  %6325 = vmatprep.subr.bf16.mxu1 %v7281_v27  ;;  %v1445_v59 = vld [vmem:[%s8407_s4 + $0x28] sm:$0xff] }
 0x29b   : > { %5442 = vmatmul.mubr.msk.f32.vlgmr.msra.gmra.mrb[70].mxu1 %vm1339_vm7, %v4500_v60  ;;  %5232 = vmatprep.mubr.msk.f32.mxu0 %vm1339_vm7, %v4426_v61 }
 0x29c   : > { %6327 = vmatpush3.bf16.msra.mxu1 %v7281_v27  ;;  %5444 = vmatprep.mubr.msk.f32.mxu1 %vm1339_vm7, %v4501_v0  ;;  %v6168_v0 = vpack.c.bf16 %v1445_v59, %v1444_v57 }
 0x29d   : > { %6329 = vmatprep.subr.bf16.mxu1 %v7287_v33  ;;  %6129 = vmatprep.subr.bf16.mxu0 %v6128_v1 }
 0x29e   : > { %5233 = vmatmul.mubr.msk.f32.gmra.mrb[46].mxu0 %vm1339_vm7, %v4427_v48  ;;  %v1448_v48 = vld [vmem:[%s8407_s4 + $0x40] sm:$0xff] }
 0x29f   : > { %5445 = vmatmul.mubr.msk.f32.gmra.mrb[72].mxu1 %vm1339_vm7, %v4502_v8  ;;  %6131 = vmatpush3.bf16.msra.mxu0 %v6128_v1  ;;  %v1446_v1 = vld [vmem:[%s8407_s4 + $0x30] sm:$0xff]  ;;  %v1449_v8 = vld [vmem:[%s8407_s4 + $0x48] sm:$0xff] }
 0x2a0   : > { %6331 = vmatpush3.bf16.msra.mxu1 %v7287_v33  ;;  %5499 = vmatprep.mubr.msk.f32.mxu1 %vm1339_vm7, %v4524_v3  ;;  %v6172_v7 = vpack.c.bf16 %v1447_v6, %v1446_v1  ;;  %v6176_v3 = vpack.c.bf16 %v1449_v8, %v1448_v48  ;;  %v4487_v8 = vld [vmem:[%s8407_s4 + $0x1a0] sm:$0xff] }
 0x2a1   : > { %6333 = vmatprep.subr.bf16.mxu1 %v7293_v42  ;;  %6133 = vmatprep.subr.bf16.mxu0 %v6132_v9 }
 0x2a3   : > { %6135 = vmatpush3.bf16.msra.mxu0 %v6132_v9  ;;  %v1450_v9 = vld [vmem:[%s8407_s4 + $0x50] sm:$0xff] }
 0x2a4   : > { %6335 = vmatpush3.bf16.msra.mxu1 %v7293_v42  ;;  %6137 = vmatprep.subr.bf16.mxu0 %v6136_v43  ;;  %v6180_v10 = vpack.c.bf16 %v1451_v23, %v1450_v9 }
 0x2a5   : > { %5497 = vmatprep.subr.msk.mxu1 %vm547_vm0, %v7295_v45 }
 0x2a7   : > { %6139 = vmatpush3.bf16.msra.mxu0 %v6136_v43  ;;  %v1452_v43 = vld [vmem:[%s8407_s4 + $0x60] sm:$0xff] }
 0x2a8   : > { %5498 = vmatpush3.msk.msra.mxu1 %vm547_vm0, %v7295_v45  ;;  %6141 = vmatprep.subr.bf16.mxu0 %v6140_v12  ;;  %v6184_v63 = vpack.c.bf16 %v1453_v11, %v1452_v43  ;;  %v4489_v43 = vld [vmem:[%s8407_s4 + $0x1b0] sm:$0xff]  ;;  %v4490_v11 = vld [vmem:[%s8407_s4 + $0x1b8] sm:$0xff] }
 0x2a9   : > { %6369 = vmatprep.subr.bf16.mxu1 %v7281_v27  ;;  %5500 = vmatmul.mubr.msk.f32.vlgmr.msra.gmra.mrb[74].mxu1 %vm1339_vm7, %v4525_v39  ;;  %v4449_v39 = vld [vmem:[%s8409_s6 + $0x40] sm:$0xff] }
 0x2aa   : > { %6371 = vmatpush3.bf16.msra.mxu1 %v7281_v27  ;;  %5502 = vmatprep.mubr.msk.f32.mxu1 %vm1339_vm7, %v4526_v58  ;;  %v4458_v58 = vld [vmem:[%s8407_s4 + $0x100] sm:$0xff] }
 0x2ab   : > { %6373 = vmatprep.subr.bf16.mxu1 %v7287_v33  ;;  %6143 = vmatpush3.bf16.msra.mxu0 %v6140_v12  ;;  %v1454_v12 = vld [vmem:[%s8407_s4 + $0x70] sm:$0xff] }
 0x2ac   : > { %6145 = vmatprep.subr.bf16.mxu0 %v6144_v13  ;;  %v6188_v19 = vpack.c.bf16 %v1455_v62, %v1454_v12  ;;  %v4491_v12 = vld [vmem:[%s8407_s4 + $0x1c0] sm:$0xff]  ;;  %v4492_v62 = vld [vmem:[%s8407_s4 + $0x1c8] sm:$0xff] }
 0x2ad   : > { %5503 = vmatmul.mubr.msk.f32.gmra.mrb[76].mxu1 %vm1339_vm7, %v4527_v16 }
 0x2ae   : > { %6375 = vmatpush3.bf16.msra.mxu1 %v7287_v33  ;;  %5557 = vmatprep.mubr.msk.f32.mxu1 %vm1339_vm7, %v4549_v17  ;;  %v4462_v17 = vld [vmem:[%s8407_s4 + $0x120] sm:$0xff] }
 0x2af   : > { %6377 = vmatprep.subr.bf16.mxu1 %v7293_v42  ;;  %6147 = vmatpush3.bf16.msra.mxu0 %v6144_v13  ;;  %v4460_v13 = vld [vmem:[%s8407_s4 + $0x110] sm:$0xff] }
 0x2b0   : > { %6149 = vmatprep.subr.bf16.mxu0 %v6148_v18 }
 0x2b2   : > { %6379 = vmatpush3.bf16.msra.mxu1 %v7293_v42 }
 0x2b3   : > { %5555 = vmatprep.subr.msk.mxu1 %vm547_vm0, %v7295_v45  ;;  %6151 = vmatpush3.bf16.msra.mxu0 %v6148_v18  ;;  %v4463_v18 = vld [vmem:[%s8407_s4 + $0x128] sm:$0xff] }
 0x2b4   : > { %6153 = vmatprep.subr.bf16.mxu0 %v6152_v35 }
 0x2b6   : > { %5556 = vmatpush3.msk.msra.mxu1 %vm547_vm0, %v7295_v45 }
 0x2b7   : > { %6413 = vmatprep.subr.bf16.mxu1 %v7281_v27  ;;  %5558 = vmatmul.mubr.msk.f32.vlgmr.msra.gmra.mrb[78].mxu1 %vm1339_vm7, %v4550_v20  ;;  %v4452_v20 = vld [vmem:[%s8409_s6 + $0x58] sm:$0x1] }
 0x2b8   : > { %6415 = vmatpush3.bf16.msra.mxu1 %v7281_v27  ;;  %5560 = vmatprep.mubr.msk.f32.mxu1 %vm1339_vm7, %v4551_v21  ;;  %v4464_v21 = vld [vmem:[%s8407_s4 + $0x130] sm:$0xff] }
 0x2b9   : > { %6417 = vmatprep.subr.bf16.mxu1 %v7287_v33  ;;  %6155 = vmatpush3.bf16.msra.mxu0 %v6152_v35  ;;  %v4468_v35 = vld [vmem:[%s8407_s4 + $0x150] sm:$0xff] }
 0x2ba   : > { %6157 = vmatprep.subr.bf16.mxu0 %v6156_v30  ;;  %v6224_v29 = vpack.c.bf16 %v4469_v32, %v4468_v35  ;;  %v4512_v35 = vld [vmem:[%s8407_s4 + $0x220] sm:$0xff]  ;;  %v4513_v32 = vld [vmem:[%s8407_s4 + $0x228] sm:$0xff] }
 0x2bb   : > { %5561 = vmatmul.mubr.msk.f32.gmra.mrb[80].mxu1 %vm1339_vm7, %v4552_v22  ;;  %v4465_v22 = vld [vmem:[%s8407_s4 + $0x138] sm:$0xff] }
 0x2bc   : > { %6419 = vmatpush3.bf16.msra.mxu1 %v7287_v33  ;;  %5615 = vmatprep.mubr.msk.f32.mxu1 %vm1339_vm7, %v4574_v24  ;;  %v6216_v24 = vpack.c.bf16 %v4465_v22, %v4464_v21  ;;  %v4510_v22 = vld [vmem:[%s8407_s4 + $0x210] sm:$0xff] }
 0x2bd   : > { %6421 = vmatprep.subr.bf16.mxu1 %v7293_v42  ;;  %6159 = vmatpush3.bf16.msra.mxu0 %v6156_v30  ;;  %v4470_v30 = vld [vmem:[%s8407_s4 + $0x160] sm:$0xff] }
 0x2be   : > { %6161 = vmatprep.subr.bf16.mxu0 %v6160_v36  ;;  %v6228_v34 = vpack.c.bf16 %v4471_v31, %v4470_v30  ;;  %v4514_v30 = vld [vmem:[%s8407_s4 + $0x230] sm:$0xff]  ;;  %v4515_v31 = vld [vmem:[%s8407_s4 + $0x238] sm:$0xff] }
 0x2c0   : > { %6423 = vmatpush3.bf16.msra.mxu1 %v7293_v42 }
 0x2c1   : > { %5613 = vmatprep.subr.msk.mxu1 %vm547_vm0, %v7295_v45 }
 0x2c4   : > { %5614 = vmatpush3.msk.msra.mxu1 %vm547_vm0, %v7295_v45 }
 0x2c5   : > { %6457 = vmatprep.subr.bf16.mxu1 %v7281_v27  ;;  %5616 = vmatmul.mubr.msk.f32.vlgmr.msra.gmra.mrb[82].mxu1 %vm1339_vm7, %v4575_v25  ;;  %v4466_v25 = vld [vmem:[%s8407_s4 + $0x140] sm:$0xff] }
 0x2c6   : > { %6459 = vmatpush3.bf16.msra.mxu1 %v7281_v27  ;;  %5618 = vmatprep.mubr.msk.f32.mxu1 %vm1339_vm7, %v4576_v37  ;;  %v6220_v28 = vpack.c.bf16 %v4467_v26, %v4466_v25  ;;  %v4473_v37 = vld [vmem:[%s8407_s4 + $0x178] sm:$0xff] }
 0x2c7   : > { %6461 = vmatprep.subr.bf16.mxu1 %v7287_v33 }
 0x2c9   : > { %5619 = vmatmul.mubr.msk.f32.gmra.mrb[84].mxu1 %vm1339_vm7, %v4577_v38 }
 0x2ca   : > { %6463 = vmatpush3.bf16.msra.mxu1 %v7287_v33  ;;  %5673 = vmatprep.mubr.msk.f32.mxu1 %vm1339_vm7, %v4599_v40  ;;  %v4483_v40 = vld [vmem:[%s8407_s4 + $0x180] sm:$0xff] }
 0x2cb   : > { %6465 = vmatprep.subr.bf16.mxu1 %v7293_v42 }
 0x2ce   : > { %6467 = vmatpush3.bf16.msra.mxu1 %v7293_v42 }
 0x2cf   : > { %5671 = vmatprep.subr.msk.mxu1 %vm547_vm0, %v7295_v45 }
 0x2d2   : > { %5672 = vmatpush3.msk.msra.mxu1 %vm547_vm0, %v7295_v45 }
 0x2d3   : > { %6500 = vmatprep.subr.bf16.mxu1 %v6703_v2  ;;  %5674 = vmatmul.mubr.msk.f32.vlgmr.msra.gmra.mrb[86].mxu1 %vm1339_vm7, %v4600_v41  ;;  %v4484_v41 = vld [vmem:[%s8407_s4 + $0x188] sm:$0xff] }
 0x2d4   : > { %5676 = vmatprep.mubr.msk.f32.mxu1 %vm1339_vm7, %v4601_v44  ;;  %v6248_v44 = vpack.c.bf16 %v4484_v41, %v4483_v40  ;;  %v4518_v40 = vld [vmem:[%s8407_s4 + $0x250] sm:$0xff]  ;;  %v4519_v41 = vld [vmem:[%s8407_s4 + $0x258] sm:$0xff] }
 0x2d7   : > { %5677 = vmatmul.mubr.msk.f32.gmra.mrb[88].mxu1 %vm1339_vm7, %v4602_v46 }
 0x2d8   : > { %5725 = vmatprep.mubr.msk.f32.mxu1 %vm6705_vm3, %v6706_v5 }
 0x35f   : > { %v5211_v47 = vpop.f32.mrb[40].mxu0  ;;  %v7668_v46 = vpop.f32.mrb[66].mxu1 }
 0x360   : > { %v1421_v49 = vpop.f32.mrb[41].mxu0 }
 0x363   : > { %v5214_v50 = vpop.f32.mrb[42].mxu0 }
 0x364   : > { %v1431_v51 = vpop.f32.mrb[43].mxu0 }
 0x36d   : > { %v5231_v54 = vpop.f32.mrb[44].mxu0 }
 0x36e   : > { %v1539_v55 = vpop.f32.mrb[45].mxu0 }
 0x36f   : > { %5267 = vmatprep.mubr.f32.mxu0 %v1539_v55 }
 0x370   : > { %5268 = vmatmul.mubr.f32.vlgmr.msra.gmra.mrb[48].mxu0 %v5231_v54 }
 0x371   : > { %6163 = vmatpush3.bf16.msra.mxu0 %v6160_v36  ;;  %v5234_v60 = vpop.f32.mrb[46].mxu0  ;;  %v4472_v36 = vld [vmem:[%s8407_s4 + $0x170] sm:$0xff] }
 0x372   : > { %v1549_v61 = vpop.f32.mrb[47].mxu0  ;;  %6165 = vmatprep.subr.bf16.mxu0 %v6164_v56  ;;  %v6232_v38 = vpack.c.bf16 %v4473_v37, %v4472_v36  ;;  %v4516_v36 = vld [vmem:[%s8407_s4 + $0x240] sm:$0xff]  ;;  %v4517_v37 = vld [vmem:[%s8407_s4 + $0x248] sm:$0xff] }
 0x373   : > { %5270 = vmatprep.mubr.f32.mxu0 %v1549_v61  ;;  %v4486_v61 = vld [vmem:[%s8407_s4 + $0x198] sm:$0xff] }
 0x374   : > { %5271 = vmatmul.mubr.f32.gmra.mrb[50].mxu0 %v5234_v60  ;;  %v4485_v60 = vld [vmem:[%s8407_s4 + $0x190] sm:$0xff] }
 0x375   : > { %6167 = vmatpush3.bf16.msra.mxu0 %v6164_v56  ;;  %5305 = vmatprep.mubr.f32.mxu0 %v1421_v49 }
 0x376   : > { %6169 = vmatprep.subr.bf16.mxu0 %v6168_v0 }
 0x379   : > { %6171 = vmatpush3.bf16.msra.mxu0 %v6168_v0 }
 0x37a   : > { %6173 = vmatprep.subr.bf16.mxu0 %v6172_v7 }
 0x37d   : > { %6175 = vmatpush3.bf16.msra.mxu0 %v6172_v7  ;;  %v6252_v7 = vpack.c.bf16 %v4486_v61, %v4485_v60 }
 0x37e   : > { %6177 = vmatprep.subr.bf16.mxu0 %v6176_v3 }
 0x381   : > { %6179 = vmatpush3.bf16.msra.mxu0 %v6176_v3  ;;  %v4488_v3 = vld [vmem:[%s8407_s4 + $0x1a8] sm:$0xff] }
 0x382   : > { %6181 = vmatprep.subr.bf16.mxu0 %v6180_v10  ;;  %v6256_v23 = vpack.c.bf16 %v4488_v3, %v4487_v8 }
 0x385   : > { %6183 = vmatpush3.bf16.msra.mxu0 %v6180_v10 }
 0x386   : > { %6185 = vmatprep.subr.bf16.mxu0 %v6184_v63 }
 0x389   : > { %6187 = vmatpush3.bf16.msra.mxu0 %v6184_v63  ;;  %v6260_v63 = vpack.c.bf16 %v4490_v11, %v4489_v43  ;;  %v4537_v11 = vld [vmem:[%s8407_s4 + $0x2a0] sm:$0xff] }
 0x38a   : > { %6189 = vmatprep.subr.bf16.mxu0 %v6188_v19 }
 0x38d   : > { %6191 = vmatpush3.bf16.msra.mxu0 %v6188_v19  ;;  %v6264_v19 = vpack.c.bf16 %v4492_v62, %v4491_v12 }
 0x38e   : > { %6193 = vmatprep.subr.bf16.mxu0 %v7281_v27 }
 0x390   : > { %5306 = vmatmul.mubr.f32.vlgmr.msra.gmra.mrb[48].mxu0 %v5211_v47  ;;  %v2036_v47 = vpop.f32.mrb[67].mxu1 }
 0x391   : > { %5308 = vmatprep.mubr.f32.mxu0 %v1431_v51  ;;  %6195 = vmatpush3.bf16.msra.mxu0 %v7281_v27  ;;  %v4459_v27 = vld [vmem:[%s8407_s4 + $0x108] sm:$0xff]  ;;  %v7670_v49 = vpop.f32.mrb[68].mxu1 }
 0x392   : > { %6197 = vmatprep.subr.bf16.mxu0 %v7287_v33  ;;  %v6204_v14 = vpack.c.bf16 %v4459_v27, %v4458_v58  ;;  %v4494_v58 = vld [vmem:[%s8407_s4 + $0x1d8] sm:$0xff] }
 0x394   : > { %5309 = vmatmul.mubr.f32.gmra.mrb[50].mxu0 %v5214_v50  ;;  %v7672_v50 = vpop.f32.mrb[69].mxu1 }
 0x395   : > { %6199 = vmatpush3.bf16.msra.mxu0 %v7287_v33  ;;  %5325 = vmatprep.mubr.msk.f32.mxu0 %vm1339_vm7, %v4449_v39  ;;  %v4461_v33 = vld [vmem:[%s8407_s4 + $0x118] sm:$0xff]  ;;  %v7674_v51 = vpop.f32.mrb[70].mxu1  ;;  %v4493_v39 = vld [vmem:[%s8407_s4 + $0x1d0] sm:$0xff] }
 0x396   : > { %6201 = vmatprep.subr.bf16.mxu0 %v7293_v42  ;;  %v6208_v16 = vpack.c.bf16 %v4461_v33, %v4460_v13  ;;  %v7676_v52 = vpop.f32.mrb[71].mxu1  ;;  %v6268_v27 = vpack.c.bf16 %v4494_v58, %v4493_v39  ;;  %v4495_v13 = vld [vmem:[%s8407_s4 + $0x1e0] sm:$0xff]  ;;  %v4496_v33 = vld [vmem:[%s8407_s4 + $0x1e8] sm:$0xff]  ;;  %v4539_v39 = vld [vmem:[%s8407_s4 + $0x2b0] sm:$0xff] }
 0x397   : > { %v7678_v53 = vpop.f32.mrb[72].mxu1  ;;  %v4540_v58 = vld [vmem:[%s8407_s4 + $0x2b8] sm:$0xff] }
 0x398   : > { %v7680_v54 = vpop.f32.mrb[73].mxu1 }
 0x399   : > { %6203 = vmatpush3.bf16.msra.mxu0 %v7293_v42  ;;  %v4451_v42 = vld [vmem:[%s8409_s6 + $0x50] sm:$0xff]  ;;  %v7682_v55 = vpop.f32.mrb[74].mxu1 }
 0x39a   : > { %5323 = vmatprep.subr.msk.mxu0 %vm547_vm0, %v7295_v45  ;;  %v7684_v56 = vpop.f32.mrb[75].mxu1 }
 0x39b   : > { %v7686_v57 = vpop.f32.mrb[76].mxu1 }
 0x39c   : > { %v7688_v59 = vpop.f32.mrb[77].mxu1 }
 0x39d   : > { %5324 = vmatpush3.msk.msra.mxu0 %vm547_vm0, %v7295_v45  ;;  %v6212_v45 = vpack.c.bf16 %v4463_v18, %v4462_v17  ;;  %v7696_v1 = vpop.f32.mrb[78].mxu1  ;;  %v4508_v17 = vld [vmem:[%s8407_s4 + $0x200] sm:$0xff]  ;;  %v4509_v18 = vld [vmem:[%s8407_s4 + $0x208] sm:$0xff] }
 0x39e   : > { %5326 = vmatmul.mubr.msk.f32.vlgmr.msra.gmra.mrb[52].mxu0 %vm1339_vm7, %v4450_v15  ;;  %6205 = vmatprep.subr.bf16.mxu0 %v6204_v14  ;;  %v7698_v48 = vpop.f32.mrb[79].mxu1  ;;  %v4497_v15 = vld [vmem:[%s8407_s4 + $0x1f0] sm:$0xff]  ;;  %v6292_v21 = vpack.c.bf16 %v4509_v18, %v4508_v17  ;;  %v4548_v17 = vld [vmem:[%s8407_s4 + $0x2f8] sm:$0xff] }
 0x39f   : > { %5328 = vmatprep.mubr.msk.f32.mxu0 %vm1339_vm7, %v4451_v42  ;;  %6207 = vmatpush3.bf16.msra.mxu0 %v6204_v14  ;;  %v6272_v14 = vpack.c.bf16 %v4496_v33, %v4495_v13  ;;  %v4498_v42 = vld [vmem:[%s8407_s4 + $0x1f8] sm:$0xff] }
 0x3a0   : > { %6209 = vmatprep.subr.bf16.mxu0 %v6208_v16 }
 0x3a2   : > { %5329 = vmatmul.mubr.msk.f32.gmra.mrb[54].mxu0 %vm1339_vm7, %v4452_v20  ;;  %v7742_v20 = vpop.f32.mrb[80].mxu1 }
 0x3a3   : > { %6211 = vmatpush3.bf16.msra.mxu0 %v6208_v16  ;;  %v6276_v16 = vpack.c.bf16 %v4498_v42, %v4497_v15  ;;  %v4546_v15 = vld [vmem:[%s8407_s4 + $0x2e8] sm:$0xff] }
 0x3a4   : > { %6213 = vmatprep.subr.bf16.mxu0 %v6212_v45 }
 0x3a7   : > { %6215 = vmatpush3.bf16.msra.mxu0 %v6212_v45  ;;  %v7744_v45 = vpop.f32.mrb[81].mxu1 }
 0x3a8   : > { %6217 = vmatprep.subr.bf16.mxu0 %v6216_v24  ;;  %v7752_v25 = vpop.f32.mrb[82].mxu1 }
 0x3ab   : > { %6219 = vmatpush3.bf16.msra.mxu0 %v6216_v24  ;;  %v4511_v24 = vld [vmem:[%s8407_s4 + $0x218] sm:$0xff] }
 0x3ac   : > { %6221 = vmatprep.subr.bf16.mxu0 %v6220_v28  ;;  %v6296_v26 = vpack.c.bf16 %v4511_v24, %v4510_v22  ;;  %v4559_v22 = vld [vmem:[%s8407_s4 + $0x308] sm:$0xff] }
 0x3af   : > { %6223 = vmatpush3.bf16.msra.mxu0 %v6220_v28  ;;  %v7754_v28 = vpop.f32.mrb[83].mxu1 }
 0x3b0   : > { %6225 = vmatprep.subr.bf16.mxu0 %v6224_v29  ;;  %v7796_v61 = vpop.f32.mrb[84].mxu1 }
 0x3b3   : > { %6227 = vmatpush3.bf16.msra.mxu0 %v6224_v29  ;;  %v6300_v29 = vpack.c.bf16 %v4513_v32, %v4512_v35  ;;  %v4561_v35 = vld [vmem:[%s8407_s4 + $0x318] sm:$0xff] }
 0x3b4   : > { %6229 = vmatprep.subr.bf16.mxu0 %v6228_v34 }
 0x3b7   : > { %6231 = vmatpush3.bf16.msra.mxu0 %v6228_v34  ;;  %v6304_v34 = vpack.c.bf16 %v4515_v31, %v4514_v30  ;;  %v4563_v30 = vld [vmem:[%s8407_s4 + $0x328] sm:$0xff] }
 0x3b8   : > { %6233 = vmatprep.subr.bf16.mxu0 %v6232_v38 }
 0x3bb   : > { %6235 = vmatpush3.bf16.msra.mxu0 %v6232_v38  ;;  %v6308_v38 = vpack.c.bf16 %v4517_v37, %v4516_v36  ;;  %v4565_v36 = vld [vmem:[%s8407_s4 + $0x338] sm:$0xff]  ;;  %v4567_v37 = vld [vmem:[%s8407_s4 + $0x348] sm:$0xff] }
 0x3bc   : > { %6249 = vmatprep.subr.bf16.mxu0 %v6248_v44 }
 0x471   : > { %v5327_v0 = vpop.f32.mrb[52].mxu0 }
 0x472   : > { %v1828_v6 = vpop.f32.mrb[53].mxu0 }
 0x473   : > { %5363 = vmatprep.mubr.f32.mxu0 %v1828_v6  ;;  %v4534_v6 = vld [vmem:[%s8407_s4 + $0x288] sm:$0xff] }
 0x474   : > { %5364 = vmatmul.mubr.f32.vlgmr.msra.gmra.mrb[48].mxu0 %v5327_v0  ;;  %v4533_v0 = vld [vmem:[%s8407_s4 + $0x280] sm:$0xff] }
 0x475   : > { %6251 = vmatpush3.bf16.msra.mxu0 %v6248_v44  ;;  %v5330_v9 = vpop.f32.mrb[54].mxu0  ;;  %v6312_v44 = vpack.c.bf16 %v4519_v41, %v4518_v40  ;;  %v6336_v8 = vpack.c.bf16 %v4534_v6, %v4533_v0  ;;  %v4570_v41 = vld [vmem:[%s8407_s4 + $0x360] sm:$0xff]  ;;  %v4585_v6 = vld [vmem:[%s8407_s4 + $0x390] sm:$0xff] }
 0x476   : > { %6253 = vmatprep.subr.bf16.mxu0 %v6252_v7  ;;  %v1838_v10 = vpop.f32.mrb[55].mxu0 }
 0x477   : > { %5366 = vmatprep.mubr.f32.mxu0 %v1838_v10 }
 0x478   : > { %5367 = vmatmul.mubr.f32.gmra.mrb[50].mxu0 %v5330_v9  ;;  %v4535_v9 = vld [vmem:[%s8407_s4 + $0x290] sm:$0xff] }
 0x479   : > { %6255 = vmatpush3.bf16.msra.mxu0 %v6252_v7  ;;  %5421 = vmatprep.mubr.f32.mxu0 %v2036_v47  ;;  %v4521_v47 = vld [vmem:[%s8407_s4 + $0x268] sm:$0xff]  ;;  %v7804_v7 = vpop.f32.mrb[85].mxu1 }
 0x47a   : > { %6257 = vmatprep.subr.bf16.mxu0 %v6256_v23  ;;  %v7806_v3 = vpop.f32.mrb[86].mxu1 }
 0x47b   : > { %v7814_v10 = vpop.f32.mrb[87].mxu1 }
 0x47c   : > { %v7823_v12 = vpop.f32.mrb[88].mxu1 }
 0x47d   : > { %6259 = vmatpush3.bf16.msra.mxu0 %v6256_v23  ;;  %v4536_v23 = vld [vmem:[%s8407_s4 + $0x298] sm:$0xff]  ;;  %v7826_v62 = vpop.f32.mrb[89].mxu1 }
 0x47e   : > { %6261 = vmatprep.subr.bf16.mxu0 %v6260_v63  ;;  %v6340_v43 = vpack.c.bf16 %v4536_v23, %v4535_v9  ;;  %v4587_v23 = vld [vmem:[%s8407_s4 + $0x3a0] sm:$0xff] }
 0x481   : > { %6263 = vmatpush3.bf16.msra.mxu0 %v6260_v63  ;;  %v4538_v63 = vld [vmem:[%s8407_s4 + $0x2a8] sm:$0xff] }
 0x482   : > { %6265 = vmatprep.subr.bf16.mxu0 %v6264_v19 }
 0x485   : > { %6267 = vmatpush3.bf16.msra.mxu0 %v6264_v19  ;;  %v6344_v19 = vpack.c.bf16 %v4538_v63, %v4537_v11  ;;  %v4589_v63 = vld [vmem:[%s8407_s4 + $0x3b0] sm:$0xff] }
 0x486   : > { %6269 = vmatprep.subr.bf16.mxu0 %v6268_v27 }
 0x489   : > { %6271 = vmatpush3.bf16.msra.mxu0 %v6268_v27  ;;  %v4542_v27 = vld [vmem:[%s8407_s4 + $0x2c8] sm:$0xff] }
 0x48a   : > { %6273 = vmatprep.subr.bf16.mxu0 %v6272_v14 }
 0x48d   : > { %6275 = vmatpush3.bf16.msra.mxu0 %v6272_v14  ;;  %v4545_v14 = vld [vmem:[%s8407_s4 + $0x2e0] sm:$0xff] }
 0x48e   : > { %6277 = vmatprep.subr.bf16.mxu0 %v6276_v16  ;;  %v6360_v42 = vpack.c.bf16 %v4546_v15, %v4545_v14  ;;  %v4608_v14 = vld [vmem:[%s8407_s4 + $0x400] sm:$0xff]  ;;  %v4609_v15 = vld [vmem:[%s8407_s4 + $0x408] sm:$0xff] }
 0x491   : > { %6279 = vmatpush3.bf16.msra.mxu0 %v6276_v16  ;;  %v4547_v16 = vld [vmem:[%s8407_s4 + $0x2f0] sm:$0xff] }
 0x492   : > { %6293 = vmatprep.subr.bf16.mxu0 %v6292_v21  ;;  %v6364_v18 = vpack.c.bf16 %v4548_v17, %v4547_v16  ;;  %v4610_v16 = vld [vmem:[%s8407_s4 + $0x410] sm:$0xff]  ;;  %v4611_v17 = vld [vmem:[%s8407_s4 + $0x418] sm:$0xff] }
 0x494   : > { %5422 = vmatmul.mubr.f32.vlgmr.msra.gmra.mrb[48].mxu0 %v7668_v46  ;;  %v4520_v46 = vld [vmem:[%s8407_s4 + $0x260] sm:$0xff] }
 0x495   : > { %6295 = vmatpush3.bf16.msra.mxu0 %v6292_v21  ;;  %5424 = vmatprep.mubr.f32.mxu0 %v7672_v50  ;;  %v4522_v50 = vld [vmem:[%s8407_s4 + $0x270] sm:$0xff]  ;;  %v4558_v21 = vld [vmem:[%s8407_s4 + $0x300] sm:$0xff] }
 0x496   : > { %6297 = vmatprep.subr.bf16.mxu0 %v6296_v26  ;;  %v6380_v24 = vpack.c.bf16 %v4559_v22, %v4558_v21  ;;  %v4612_v21 = vld [vmem:[%s8407_s4 + $0x420] sm:$0xff]  ;;  %v4613_v22 = vld [vmem:[%s8407_s4 + $0x428] sm:$0xff] }
 0x498   : > { %5425 = vmatmul.mubr.f32.gmra.mrb[50].mxu0 %v7670_v49  ;;  %v6316_v49 = vpack.c.bf16 %v4521_v47, %v4520_v46  ;;  %v4572_v47 = vld [vmem:[%s8407_s4 + $0x370] sm:$0xff] }
 0x499   : > { %6299 = vmatpush3.bf16.msra.mxu0 %v6296_v26  ;;  %5479 = vmatprep.mubr.f32.mxu0 %v7676_v52  ;;  %v4523_v52 = vld [vmem:[%s8407_s4 + $0x278] sm:$0xff]  ;;  %v4560_v26 = vld [vmem:[%s8407_s4 + $0x310] sm:$0xff] }
 0x49a   : > { %6301 = vmatprep.subr.bf16.mxu0 %v6300_v29  ;;  %v6320_v60 = vpack.c.bf16 %v4523_v52, %v4522_v50  ;;  %v6384_v32 = vpack.c.bf16 %v4561_v35, %v4560_v26  ;;  %v4583_v52 = vld [vmem:[%s8407_s4 + $0x380] sm:$0xff]  ;;  %v4614_v26 = vld [vmem:[%s8407_s4 + $0x430] sm:$0xff]  ;;  %v4615_v35 = vld [vmem:[%s8407_s4 + $0x438] sm:$0xff] }
 0x49d   : > { %6303 = vmatpush3.bf16.msra.mxu0 %v6300_v29  ;;  %v4562_v29 = vld [vmem:[%s8407_s4 + $0x320] sm:$0xff] }
 0x49e   : > { %6305 = vmatprep.subr.bf16.mxu0 %v6304_v34  ;;  %v6388_v31 = vpack.c.bf16 %v4563_v30, %v4562_v29 }
 0x4a1   : > { %6307 = vmatpush3.bf16.msra.mxu0 %v6304_v34  ;;  %v4564_v34 = vld [vmem:[%s8407_s4 + $0x330] sm:$0xff] }
 0x4a2   : > { %6309 = vmatprep.subr.bf16.mxu0 %v6308_v38 }
 0x4a5   : > { %6311 = vmatpush3.bf16.msra.mxu0 %v6308_v38 }
 0x4a6   : > { %6313 = vmatprep.subr.bf16.mxu0 %v6312_v44 }
 0x4a9   : > { %6315 = vmatpush3.bf16.msra.mxu0 %v6312_v44  ;;  %v4571_v44 = vld [vmem:[%s8407_s4 + $0x368] sm:$0xff] }
 0x4aa   : > { %6317 = vmatprep.subr.bf16.mxu0 %v6316_v49  ;;  %v6404_v46 = vpack.c.bf16 %v4571_v44, %v4570_v41 }
 0x4ad   : > { %6319 = vmatpush3.bf16.msra.mxu0 %v6316_v49  ;;  %v4573_v49 = vld [vmem:[%s8407_s4 + $0x378] sm:$0xff] }
 0x4ae   : > { %6321 = vmatprep.subr.bf16.mxu0 %v6320_v60  ;;  %v6408_v50 = vpack.c.bf16 %v4573_v49, %v4572_v47 }
 0x4b1   : > { %6323 = vmatpush3.bf16.msra.mxu0 %v6320_v60  ;;  %v4584_v60 = vld [vmem:[%s8407_s4 + $0x388] sm:$0xff] }
 0x4b2   : > { %6337 = vmatprep.subr.bf16.mxu0 %v6336_v8  ;;  %v6424_v0 = vpack.c.bf16 %v4584_v60, %v4583_v52 }
 0x4b4   : > { %5480 = vmatmul.mubr.f32.vlgmr.msra.gmra.mrb[48].mxu0 %v7674_v51  ;;  %v6348_v51 = vpack.c.bf16 %v4540_v58, %v4539_v39  ;;  %v4592_v39 = vld [vmem:[%s8407_s4 + $0x3c8] sm:$0xff] }
 0x4b5   : > { %6339 = vmatpush3.bf16.msra.mxu0 %v6336_v8  ;;  %5482 = vmatprep.mubr.f32.mxu0 %v7680_v54  ;;  %v4541_v54 = vld [vmem:[%s8407_s4 + $0x2c0] sm:$0xff]  ;;  %v4586_v8 = vld [vmem:[%s8407_s4 + $0x398] sm:$0xff] }
 0x4b6   : > { %6341 = vmatprep.subr.bf16.mxu0 %v6340_v43  ;;  %v6352_v13 = vpack.c.bf16 %v4542_v27, %v4541_v54  ;;  %v6428_v9 = vpack.c.bf16 %v4586_v8, %v4585_v6  ;;  %v4595_v54 = vld [vmem:[%s8407_s4 + $0x3e0] sm:$0xff]  ;;  %v4596_v27 = vld [vmem:[%s8407_s4 + $0x3e8] sm:$0xff] }
 0x4b7   : > { %v4627_v6 = vld [vmem:[%s8410_s7 + $0x4] sm:$0xf]  ;;  %v4630_v8 = vld [vmem:[%s8410_s7 + $0x8] sm:$0xf] }
 0x4b8   : > { %5483 = vmatmul.mubr.f32.gmra.mrb[50].mxu0 %v7678_v53  ;;  %v4543_v53 = vld [vmem:[%s8407_s4 + $0x2d0] sm:$0xff] }
 0x4b9   : > { %6343 = vmatpush3.bf16.msra.mxu0 %v6340_v43  ;;  %5537 = vmatprep.mubr.f32.mxu0 %v7684_v56  ;;  %v4544_v56 = vld [vmem:[%s8407_s4 + $0x2d8] sm:$0xff]  ;;  %v4588_v43 = vld [vmem:[%s8407_s4 + $0x3a8] sm:$0xff] }
 0x4ba   : > { %6345 = vmatprep.subr.bf16.mxu0 %v6344_v19  ;;  %v6356_v33 = vpack.c.bf16 %v4544_v56, %v4543_v53  ;;  %v6432_v11 = vpack.c.bf16 %v4588_v43, %v4587_v23  ;;  %v4597_v53 = vld [vmem:[%s8407_s4 + $0x3f0] sm:$0xff]  ;;  %v4598_v56 = vld [vmem:[%s8407_s4 + $0x3f8] sm:$0xff] }
 0x4bd   : > { %6347 = vmatpush3.bf16.msra.mxu0 %v6344_v19  ;;  %v4590_v19 = vld [vmem:[%s8407_s4 + $0x3b8] sm:$0xff] }
 0x4be   : > { %6349 = vmatprep.subr.bf16.mxu0 %v6348_v51 }
 0x4c1   : > { %6351 = vmatpush3.bf16.msra.mxu0 %v6348_v51 }
 0x4c2   : > { %6353 = vmatprep.subr.bf16.mxu0 %v6352_v13 }
 0x4c5   : > { %6355 = vmatpush3.bf16.msra.mxu0 %v6352_v13  ;;  %v6448_v13 = vpack.c.bf16 %v4596_v27, %v4595_v54  ;;  %v4642_v54 = vld [vmem:[%s8411_s8 + $0x88] sm:$0xff]  ;;  %v4638_v27 = vld [vmem:[%s8413_s10 + $0x1] sm:$0x1] }
 0x4c6   : > { %6357 = vmatprep.subr.bf16.mxu0 %v6356_v33 }
 0x4c9   : > { %6359 = vmatpush3.bf16.msra.mxu0 %v6356_v33  ;;  %v6452_v33 = vpack.c.bf16 %v4598_v56, %v4597_v53  ;;  %v4643_v53 = vld [vmem:[%s8411_s8 + $0x90] sm:$0xff]  ;;  %v4644_v56 = vld [vmem:[%s8411_s8 + $0x98] sm:$0xff] }
 0x4ca   : > { %6361 = vmatprep.subr.bf16.mxu0 %v6360_v42 }
 0x4cd   : > { %6363 = vmatpush3.bf16.msra.mxu0 %v6360_v42  ;;  %v6468_v42 = vpack.c.bf16 %v4609_v15, %v4608_v14  ;;  %v4645_v14 = vld [vmem:[%s8411_s8 + $0xa0] sm:$0xff]  ;;  %v4646_v15 = vld [vmem:[%s8411_s8 + $0xa8] sm:$0xff] }
 0x4ce   : > { %6365 = vmatprep.subr.bf16.mxu0 %v6364_v18 }
 0x4d1   : > { %6367 = vmatpush3.bf16.msra.mxu0 %v6364_v18  ;;  %v6472_v18 = vpack.c.bf16 %v4611_v17, %v4610_v16  ;;  %v4647_v16 = vld [vmem:[%s8411_s8 + $0xb0] sm:$0xff]  ;;  %v4648_v17 = vld [vmem:[%s8411_s8 + $0xb8] sm:$0xff] }
 0x4d2   : > { %6381 = vmatprep.subr.bf16.mxu0 %v6380_v24 }
 0x4d4   : > { %5538 = vmatmul.mubr.f32.vlgmr.msra.gmra.mrb[48].mxu0 %v7682_v55  ;;  %v6392_v55 = vpack.c.bf16 %v4565_v36, %v4564_v34  ;;  %v4621_v34 = vld [vmem:[%s8407_s4 + $0x468] sm:$0xff] }
 0x4d5   : > { %6383 = vmatpush3.bf16.msra.mxu0 %v6380_v24  ;;  %5540 = vmatprep.mubr.f32.mxu0 %v7688_v59  ;;  %v4566_v59 = vld [vmem:[%s8407_s4 + $0x340] sm:$0xff]  ;;  %v6476_v24 = vpack.c.bf16 %v4613_v22, %v4612_v21  ;;  %v4650_v22 = vld [vmem:[%s8411_s8 + $0xc8] sm:$0xff] }
 0x4d6   : > { %6385 = vmatprep.subr.bf16.mxu0 %v6384_v32  ;;  %v6396_v38 = vpack.c.bf16 %v4567_v37, %v4566_v59  ;;  %v4623_v59 = vld [vmem:[%s8407_s4 + $0x478] sm:$0xff]  ;;  %v4649_v21 = vld [vmem:[%s8411_s8 + $0xc0] sm:$0xff] }
 0x4d8   : > { %5541 = vmatmul.mubr.f32.gmra.mrb[50].mxu0 %v7686_v57  ;;  %v4568_v57 = vld [vmem:[%s8407_s4 + $0x350] sm:$0xff] }
 0x4d9   : > { %6387 = vmatpush3.bf16.msra.mxu0 %v6384_v32  ;;  %5595 = vmatprep.mubr.f32.mxu0 %v7698_v48  ;;  %v4569_v48 = vld [vmem:[%s8407_s4 + $0x358] sm:$0xff]  ;;  %v4617_v32 = vld [vmem:[%s8407_s4 + $0x448] sm:$0xff] }
 0x4da   : > { %6389 = vmatprep.subr.bf16.mxu0 %v6388_v31  ;;  %v6400_v40 = vpack.c.bf16 %v4569_v48, %v4568_v57 }
 0x4dd   : > { %6391 = vmatpush3.bf16.msra.mxu0 %v6388_v31  ;;  %v4620_v31 = vld [vmem:[%s8407_s4 + $0x460] sm:$0xff] }
 0x4de   : > { %6393 = vmatprep.subr.bf16.mxu0 %v6392_v55  ;;  %v6492_v36 = vpack.c.bf16 %v4621_v34, %v4620_v31  ;;  %v3600_v31 = vld [vmem:[%s8411_s8] sm:$0xff]  ;;  %v3601_v34 = vld [vmem:[%s8411_s8 + $0x8] sm:$0xff] }
 0x4e1   : > { %6395 = vmatpush3.bf16.msra.mxu0 %v6392_v55  ;;  %v4622_v55 = vld [vmem:[%s8407_s4 + $0x470] sm:$0xff] }
 0x4e2   : > { %6397 = vmatprep.subr.bf16.mxu0 %v6396_v38  ;;  %v6496_v37 = vpack.c.bf16 %v4623_v59, %v4622_v55  ;;  %v6553_v59 = vpack.c.bf16 %v3601_v34, %v3600_v31  ;;  %v4676_v34 = vld [vmem:[%s8413_s10 + $0x3] sm:$0x1] }
 0x4e5   : > { %6399 = vmatpush3.bf16.msra.mxu0 %v6396_v38  ;;  %v4624_v38 = vld [vmem:[%s8408_s5] ss:$0 sm:$0xff] }
 0x4e6   : > { %6401 = vmatprep.subr.bf16.mxu0 %v6400_v40 }
 0x4e9   : > { %6403 = vmatpush3.bf16.msra.mxu0 %v6400_v40 }
 0x4ea   : > { %6405 = vmatprep.subr.bf16.mxu0 %v6404_v46 }
 0x4ed   : > { %6407 = vmatpush3.bf16.msra.mxu0 %v6404_v46 }
 0x4ee   : > { %6409 = vmatprep.subr.bf16.mxu0 %v6408_v50 }
 0x4f1   : > { %6411 = vmatpush3.bf16.msra.mxu0 %v6408_v50 }
 0x4f2   : > { %6425 = vmatprep.subr.bf16.mxu0 %v6424_v0 }
 0x4f4   : > { %5596 = vmatmul.mubr.f32.vlgmr.msra.gmra.mrb[48].mxu0 %v7696_v1  ;;  %v6436_v1 = vpack.c.bf16 %v4590_v19, %v4589_v63 }
 0x4f5   : > { %6427 = vmatpush3.bf16.msra.mxu0 %v6424_v0  ;;  %5598 = vmatprep.mubr.f32.mxu0 %v7744_v45  ;;  %v4591_v45 = vld [vmem:[%s8407_s4 + $0x3c0] sm:$0xff] }
 0x4f6   : > { %6429 = vmatprep.subr.bf16.mxu0 %v6428_v9  ;;  %v6440_v58 = vpack.c.bf16 %v4592_v39, %v4591_v45  ;;  %v3216_v0 = vld [vmem:[%s8410_s7] sm:$0xf] }
 0x4f8   : > { %5599 = vmatmul.mubr.f32.gmra.mrb[50].mxu0 %v7742_v20  ;;  %v4593_v20 = vld [vmem:[%s8407_s4 + $0x3d0] sm:$0xff] }
 0x4f9   : > { %6431 = vmatpush3.bf16.msra.mxu0 %v6428_v9  ;;  %5653 = vmatprep.mubr.f32.mxu0 %v7754_v28  ;;  %v4594_v28 = vld [vmem:[%s8407_s4 + $0x3d8] sm:$0xff]  ;;  %v4633_v9 = vld [vmem:[%s8410_s7 + $0xc] sm:$0xf] }
 0x4fa   : > { %6433 = vmatprep.subr.bf16.mxu0 %v6432_v11  ;;  %v6444_v51 = vpack.c.bf16 %v4594_v28, %v4593_v20  ;;  %v3522_v20 = vld [vmem:[%s8413_s10] sm:$0x1] }
 0x4fd   : > { %6435 = vmatpush3.bf16.msra.mxu0 %v6432_v11 }
 0x4fe   : > { %6437 = vmatprep.subr.bf16.mxu0 %v6436_v1 }
 0x501   : > { %6439 = vmatpush3.bf16.msra.mxu0 %v6436_v1 }
 0x502   : > { %6441 = vmatprep.subr.bf16.mxu0 %v6440_v58 }
 0x505   : > { %6443 = vmatpush3.bf16.msra.mxu0 %v6440_v58 }
 0x506   : > { %6445 = vmatprep.subr.bf16.mxu0 %v6444_v51 }
 0x509   : > { %6447 = vmatpush3.bf16.msra.mxu0 %v6444_v51  ;;  %v4641_v51 = vld [vmem:[%s8411_s8 + $0x80] sm:$0xff] }
 0x50a   : > { %6449 = vmatprep.subr.bf16.mxu0 %v6448_v13 }
 0x50d   : > { %6451 = vmatpush3.bf16.msra.mxu0 %v6448_v13  ;;  %v6529_v13 = vpack.c.bf16 %v4642_v54, %v4641_v51  ;;  %v4665_v51 = vld [vmem:[%s8411_s8 + $0x128] sm:$0xff] }
 0x50e   : > { %6453 = vmatprep.subr.bf16.mxu0 %v6452_v33 }
 0x511   : > { %6455 = vmatpush3.bf16.msra.mxu0 %v6452_v33  ;;  %v6532_v33 = vpack.c.bf16 %v4644_v56, %v4643_v53  ;;  %v4668_v56 = vld [vmem:[%s8411_s8 + $0x140] sm:$0xff] }
 0x512   : > { %6469 = vmatprep.subr.bf16.mxu0 %v6468_v42 }
 0x514   : > { %5654 = vmatmul.mubr.f32.vlgmr.msra.gmra.mrb[48].mxu0 %v7752_v25  ;;  %v6480_v25 = vpack.c.bf16 %v4615_v35, %v4614_v26  ;;  %v4651_v26 = vld [vmem:[%s8411_s8 + $0xd0] sm:$0xff]  ;;  %v4652_v35 = vld [vmem:[%s8411_s8 + $0xd8] sm:$0xff] }
 0x515   : > { %6471 = vmatpush3.bf16.msra.mxu0 %v6468_v42  ;;  %5656 = vmatprep.mubr.f32.mxu0 %v7804_v7  ;;  %v4616_v7 = vld [vmem:[%s8407_s4 + $0x440] sm:$0xff]  ;;  %v6535_v42 = vpack.c.bf16 %v4646_v15, %v4645_v14  ;;  %v4670_v15 = vld [vmem:[%s8411_s8 + $0x150] sm:$0xff] }
 0x516   : > { %6473 = vmatprep.subr.bf16.mxu0 %v6472_v18  ;;  %v6484_v29 = vpack.c.bf16 %v4617_v32, %v4616_v7  ;;  %v4653_v7 = vld [vmem:[%s8411_s8 + $0xe0] sm:$0xff]  ;;  %v4654_v32 = vld [vmem:[%s8411_s8 + $0xe8] sm:$0xff] }
 0x518   : > { %5657 = vmatmul.mubr.f32.gmra.mrb[50].mxu0 %v7796_v61  ;;  %v4618_v61 = vld [vmem:[%s8407_s4 + $0x450] sm:$0xff] }
 0x519   : > { %6475 = vmatpush3.bf16.msra.mxu0 %v6472_v18  ;;  %5711 = vmatprep.mubr.f32.mxu0 %v7814_v10  ;;  %v4619_v10 = vld [vmem:[%s8407_s4 + $0x458] sm:$0xff]  ;;  %v6538_v18 = vpack.c.bf16 %v4648_v17, %v4647_v16  ;;  %v4672_v17 = vld [vmem:[%s8411_s8 + $0x160] sm:$0xff] }
 0x51a   : > { %6477 = vmatprep.subr.bf16.mxu0 %v6476_v24  ;;  %v6488_v30 = vpack.c.bf16 %v4619_v10, %v4618_v61  ;;  %v4655_v61 = vld [vmem:[%s8411_s8 + $0xf0] sm:$0xff]  ;;  %v4656_v10 = vld [vmem:[%s8411_s8 + $0xf8] sm:$0xff] }
 0x51d   : > { %6479 = vmatpush3.bf16.msra.mxu0 %v6476_v24  ;;  %v6541_v24 = vpack.c.bf16 %v4650_v22, %v4649_v21  ;;  %v4674_v22 = vld [vmem:[%s8411_s8 + $0x170] sm:$0xff] }
 0x51e   : > { %6481 = vmatprep.subr.bf16.mxu0 %v6480_v25 }
 0x521   : > { %6483 = vmatpush3.bf16.msra.mxu0 %v6480_v25  ;;  %v6544_v25 = vpack.c.bf16 %v4652_v35, %v4651_v26 }
 0x522   : > { %6485 = vmatprep.subr.bf16.mxu0 %v6484_v29 }
 0x525   : > { %6487 = vmatpush3.bf16.msra.mxu0 %v6484_v29  ;;  %v6547_v29 = vpack.c.bf16 %v4654_v32, %v4653_v7 }
 0x526   : > { %6489 = vmatprep.subr.bf16.mxu0 %v6488_v30 }
 0x529   : > { %6491 = vmatpush3.bf16.msra.mxu0 %v6488_v30  ;;  %v6550_v30 = vpack.c.bf16 %v4656_v10, %v4655_v61  ;;  %v4679_v61 = vld [vmem:[%s8411_s8 + $0x180] sm:$0xff]  ;;  %v4680_v10 = vld [vmem:[%s8411_s8 + $0x188] sm:$0xff] }
 0x52a   : > { %6493 = vmatprep.subr.bf16.mxu0 %v6492_v36 }
 0x52d   : > { %6495 = vmatpush3.bf16.msra.mxu0 %v6492_v36 }
 0x52e   : > { %6497 = vmatprep.subr.bf16.mxu0 %v6496_v37 }
 0x531   : > { %6499 = vmatpush3.bf16.msra.mxu0 %v6496_v37  ;;  %v3602_v37 = vld [vmem:[%s8411_s8 + $0x10] sm:$0xff] }
 0x532   : > { %6624 = vmatprep.subr.bf16.mxu0 %v6703_v2 }
 0x534   : > { %5712 = vmatmul.mubr.f32.vlgmr.msra.gmra.mrb[48].mxu0 %v7806_v3 }
 0x535   : > { %5714 = vmatprep.mubr.f32.mxu0 %v7826_v62 }
 0x538   : > { %5715 = vmatmul.mubr.f32.gmra.mrb[50].mxu0 %v7823_v12 }
 0x539   : > { %5953 = vmatprep.mubr.msk.f32.mxu0 %vm6705_vm3, %v6706_v5 }
 0x607   : > { %v5713_v57 = vpop.f32.mrb[48].mxu0 }
 0x608   : > { %v3209_v48 = vadd.f32 %v5713_v57, %v4624_v38  ;;  %v3178_v40 = vpop.f32.mrb[49].mxu0 }
 0x609   : > { %v3208_v41 = vadd.f32 %v4624_v38, %v3178_v40 }
 0x60a   : > { %v3213_v44 = vmax.f32 %v3209_v48, 0.0 }
 0x60b   : > { %v3212_v46 = vmax.f32 %v3208_v41, 0.0  ;;  %v5716_v47 = vpop.f32.mrb[50].mxu0  ;;  %v3604_v41 = vld [vmem:[%s8411_s8 + $0x20] sm:$0xff] }
 0x60c   : > { %v3211_v49 = vadd.f32 %v5716_v47, %v4624_v38  ;;  %v3188_v3 = vpop.f32.mrb[51].mxu0  ;;  %v3606_v47 = vld [vmem:[%s8411_s8 + $0x30] sm:$0xff] }
 0x60d   : > { %v6501_v50 = vpack.c.bf16 %v3213_v44, %v3212_v46  ;;  %v3210_v62 = vadd.f32 %v4624_v38, %v3188_v3  ;;  %v3603_v38 = vld [vmem:[%s8411_s8 + $0x18] sm:$0xff]  ;;  %v3605_v44 = vld [vmem:[%s8411_s8 + $0x28] sm:$0xff] }
 0x60e   : > { %v3215_v52 = vmax.f32 %v3211_v49, 0.0  ;;  %v6556_v40 = vpack.c.bf16 %v3603_v38, %v3602_v37  ;;  %v6559_v46 = vpack.c.bf16 %v3605_v44, %v3604_v41  ;;  %v3607_v49 = vld [vmem:[%s8411_s8 + $0x38] sm:$0xff]  ;;  %v4683_v37 = vld [vmem:[%s8411_s8 + $0x1a0] sm:$0xff]  ;;  %v4684_v38 = vld [vmem:[%s8411_s8 + $0x1a8] sm:$0xff] }
 0x60f   : > { %v3214_v12 = vmax.f32 %v3210_v62, 0.0  ;;  %6502 = vmatpush3.bf16.msra.mxu1 %v6501_v50  ;;  %v6562_v3 = vpack.c.bf16 %v3607_v49, %v3606_v47  ;;  %v3609_v62 = vld [vmem:[%s8411_s8 + $0x48] sm:$0xff]  ;;  %v4687_v41 = vld [vmem:[%s8411_s8 + $0x1c0] sm:$0xff]  ;;  %v4689_v47 = vld [vmem:[%s8411_s8 + $0x1d0] sm:$0xff] }
 0x610   : > { %6503 = vmatprep.subr.bf16.mxu1 %v6703_v2  ;;  %v4688_v44 = vld [vmem:[%s8411_s8 + $0x1c8] sm:$0xff]  ;;  %v4690_v49 = vld [vmem:[%s8411_s8 + $0x1d8] sm:$0xff] }
 0x611   : > { %v6504_v60 = vpack.c.bf16 %v3215_v52, %v3214_v12  ;;  %v3610_v12 = vld [vmem:[%s8411_s8 + $0x50] sm:$0xff] }
 0x613   : > { %6506 = vmatpush3.bf16.msk.msra.mxu1 %vm6793_vm2, %v6504_v60 }
 0x614   : > { %6507 = vmatprep.subr.bf16.mxu1 %v6703_v2 }
 0x616   : > { %5726 = vmatmul.mubr.msk.f32.vlgmr.msra.gmra.mrb[90].mxu1 %vm3217_vm8, %v3216_v0 }
 0x617   : > { %6509 = vmatpush3.bf16.msra.mxu1 %v6501_v50  ;;  %5736 = vmatprep.mubr.msk.f32.mxu1 %vm6705_vm3, %v6706_v5 }
 0x618   : > { %6510 = vmatprep.subr.bf16.mxu1 %v6703_v2 }
 0x61b   : > { %6513 = vmatpush3.bf16.msk.msra.mxu1 %vm6793_vm2, %v6504_v60 }
 0x61c   : > { %6514 = vmatprep.subr.bf16.mxu1 %v6703_v2 }
 0x61e   : > { %5737 = vmatmul.mubr.msk.f32.vlgmr.msra.gmra.mrb[92].mxu1 %vm3217_vm8, %v4627_v6  ;;  %v3612_v6 = vld [vmem:[%s8411_s8 + $0x60] sm:$0xff] }
 0x61f   : > { %6516 = vmatpush3.bf16.msra.mxu1 %v6501_v50  ;;  %5747 = vmatprep.mubr.msk.f32.mxu1 %vm6705_vm3, %v6706_v5 }
 0x620   : > { %6517 = vmatprep.subr.bf16.mxu1 %v6703_v2 }
 0x623   : > { %6520 = vmatpush3.bf16.msk.msra.mxu1 %vm6793_vm2, %v6504_v60 }
 0x624   : > { %6521 = vmatprep.subr.bf16.mxu1 %v6703_v2 }
 0x626   : > { %5748 = vmatmul.mubr.msk.f32.vlgmr.msra.gmra.mrb[94].mxu1 %vm3217_vm8, %v4630_v8  ;;  %v3613_v8 = vld [vmem:[%s8411_s8 + $0x68] sm:$0xff] }
 0x627   : > { %6523 = vmatpush3.bf16.msra.mxu1 %v6501_v50  ;;  %5758 = vmatprep.mubr.msk.f32.mxu1 %vm6705_vm3, %v6706_v5  ;;  %v3608_v50 = vld [vmem:[%s8411_s8 + $0x40] sm:$0xff] }
 0x628   : > { %6524 = vmatprep.subr.bf16.mxu1 %v6703_v2  ;;  %v6565_v52 = vpack.c.bf16 %v3609_v62, %v3608_v50  ;;  %v4691_v50 = vld [vmem:[%s8411_s8 + $0x1e0] sm:$0xff]  ;;  %v4692_v62 = vld [vmem:[%s8411_s8 + $0x1e8] sm:$0xff] }
 0x62b   : > { %6527 = vmatpush3.bf16.msk.msra.mxu1 %vm6793_vm2, %v6504_v60  ;;  %v3611_v60 = vld [vmem:[%s8411_s8 + $0x58] sm:$0xff] }
 0x62c   : > { %5761 = vmatprep.subr.mxu1 %v6706_v5  ;;  %v6568_v0 = vpack.c.bf16 %v3611_v60, %v3610_v12  ;;  %v4693_v12 = vld [vmem:[%s8411_s8 + $0x1f0] sm:$0xff]  ;;  %v4694_v60 = vld [vmem:[%s8411_s8 + $0x1f8] sm:$0xff] }
 0x62e   : > { %5759 = vmatmul.mubr.msk.f32.vlgmr.msra.gmra.mrb[96].mxu1 %vm3217_vm8, %v4633_v9  ;;  %v6571_v9 = vpack.c.bf16 %v3613_v8, %v3612_v6  ;;  %v4177_v6 = vld [vmem:[%s8414_s11] sm:$0xff]  ;;  %v4178_v8 = vld [vmem:[%s8414_s11 + $0x8] sm:$0xff] }
 0x62f   : > { %5763 = vmatprep.mubr.msk.f32.mxu1 %vm6705_vm3, %v6706_v5 }
 0x6e9   : > { %v3290_v23 = vpop.f32.mrb[90].mxu1 }
 0x6ea   : > { %v5727_v43 = vpop.f32.mrb[91].mxu1 }
 0x6eb   : > { %v3615_v43 = vld [vmem:[%s8411_s8 + $0x78] sm:$0xff] }
 0x6f1   : > { %v3365_v11 = vpop.f32.mrb[92].mxu1 }
 0x6f2   : > { %v3369_v63 = vmax.f32 %v3290_v23, %v3365_v11  ;;  %v5738_v19 = vpop.f32.mrb[93].mxu1  ;;  %v3614_v23 = vld [vmem:[%s8411_s8 + $0x70] sm:$0xff] }
 0x6f3   : > { %v6574_v11 = vpack.c.bf16 %v3615_v43, %v3614_v23  ;;  %v4661_v19 = vld [vmem:[%s8411_s8 + $0x108] sm:$0xff]  ;;  %v6625_v23 = vpack.c.bf16 %v4178_v8, %v4177_v6  ;;  %v4180_v43 = vld [vmem:[%s8414_s11 + $0x18] sm:$0xff] }
 0x6f5   : > { %6626 = vmatpush3.bf16.msra.mxu0 %v6625_v23 }
 0x6f6   : > { %6627 = vmatprep.subr.bf16.mxu0 %v6703_v2 }
 0x6f9   : > { %v3441_v1 = vpop.f32.mrb[94].mxu1 }
 0x6fa   : > { %v3445_v45 = vmax.f32 %v3369_v63, %v3441_v1  ;;  %v5749_v4 = vpop.f32.mrb[95].mxu1  ;;  %v4660_v63 = vld [vmem:[%s8411_s8 + $0x100] sm:$0xff] }
 0x6fb   : > { %v4657_v1 = vld [vmem:[%s8413_s10 + $0x2] sm:$0x1]  ;;  %v4662_v4 = vld [vmem:[%s8411_s8 + $0x110] sm:$0xff] }
 0x701   : > { %v3517_v39 = vpop.f32.mrb[96].mxu1 }
 0x702   : > { %v8065_v58 = vmax.f32 %v3445_v45, %v3517_v39  ;;  %v5760_v28 = vpop.f32.mrb[97].mxu1  ;;  %v6577_v45 = vpack.c.bf16 %v4661_v19, %v4660_v63  ;;  %v4663_v39 = vld [vmem:[%s8411_s8 + $0x118] sm:$0xff]  ;;  %v4181_v63 = vld [vmem:[%s8414_s11 + $0x20] sm:$0xff]  ;;  %v4182_v19 = vld [vmem:[%s8414_s11 + $0x28] sm:$0xff] }
 0x703   : > { %v6580_v28 = vpack.c.bf16 %v4663_v39, %v4662_v4  ;;  %v4184_v4 = vld [vmem:[%s8414_s11 + $0x38] sm:$0xff] }
 0x704   : > { %5762 = vmatpush3.msk.msra.mxu1 %vm802_vm6, %v8065_v58 }
 0x705   : > { %5764 = vmatmul.mubr.msk.f32.vlgmr.msra.gmra.mrb[98].mxu1 %vm3523_vm9, %v3522_v20  ;;  %5766 = vmatprep.subr.mxu1 %v6706_v5  ;;  %v4664_v20 = vld [vmem:[%s8411_s8 + $0x120] sm:$0xff] }
 0x706   : > { %5767 = vmatpush3.msk.msra.mxu1 %vm802_vm6, %v8065_v58  ;;  %5768 = vmatprep.mubr.msk.f32.mxu1 %vm6705_vm3, %v6706_v5  ;;  %v6583_v54 = vpack.c.bf16 %v4665_v51, %v4664_v20  ;;  %v4185_v20 = vld [vmem:[%s8414_s11 + $0x40] sm:$0xff] }
 0x707   : > { %6528 = vmatprep.subr.bf16.mxu1 %v6703_v2 }
 0x709   : > { %5769 = vmatmul.mubr.msk.f32.vlgmr.msra.gmra.mrb[100].mxu1 %vm3523_vm9, %v4638_v27  ;;  %v4666_v27 = vld [vmem:[%s8411_s8 + $0x130] sm:$0xff] }
 0x70a   : > { %6530 = vmatpush3.bf16.msra.mxu1 %v6529_v13  ;;  %5803 = vmatprep.mubr.msk.f32.mxu1 %vm6705_vm3, %v6706_v5  ;;  %v4667_v13 = vld [vmem:[%s8411_s8 + $0x138] sm:$0xff] }
 0x70b   : > { %6531 = vmatprep.subr.bf16.mxu1 %v6703_v2  ;;  %v6586_v53 = vpack.c.bf16 %v4667_v13, %v4666_v27  ;;  %v4188_v27 = vld [vmem:[%s8414_s11 + $0x58] sm:$0xff] }
 0x70e   : > { %6533 = vmatpush3.bf16.msra.mxu1 %v6532_v33  ;;  %v4669_v33 = vld [vmem:[%s8411_s8 + $0x148] sm:$0xff] }
 0x70f   : > { %6534 = vmatprep.subr.bf16.mxu1 %v6703_v2  ;;  %v6589_v14 = vpack.c.bf16 %v4669_v33, %v4668_v56 }
 0x712   : > { %6536 = vmatpush3.bf16.msra.mxu1 %v6535_v42  ;;  %v4671_v42 = vld [vmem:[%s8411_s8 + $0x158] sm:$0xff] }
 0x713   : > { %6537 = vmatprep.subr.bf16.mxu1 %v6703_v2  ;;  %v6592_v16 = vpack.c.bf16 %v4671_v42, %v4670_v15  ;;  %v4189_v42 = vld [vmem:[%s8414_s11 + $0x60] sm:$0xff] }
 0x716   : > { %6539 = vmatpush3.bf16.msra.mxu1 %v6538_v18  ;;  %v4673_v18 = vld [vmem:[%s8411_s8 + $0x168] sm:$0xff] }
 0x717   : > { %6540 = vmatprep.subr.bf16.mxu1 %v6703_v2  ;;  %v6595_v21 = vpack.c.bf16 %v4673_v18, %v4672_v17  ;;  %v4191_v18 = vld [vmem:[%s8414_s11 + $0x70] sm:$0xff] }
 0x71a   : > { %6542 = vmatpush3.bf16.msra.mxu1 %v6541_v24  ;;  %v4675_v24 = vld [vmem:[%s8411_s8 + $0x178] sm:$0xff] }
 0x71b   : > { %6543 = vmatprep.subr.bf16.mxu1 %v6703_v2  ;;  %v6598_v26 = vpack.c.bf16 %v4675_v24, %v4674_v22 }
 0x71e   : > { %6545 = vmatpush3.bf16.msra.mxu1 %v6544_v25 }
 0x71f   : > { %6546 = vmatprep.subr.bf16.mxu1 %v6703_v2 }
 0x722   : > { %6548 = vmatpush3.bf16.msra.mxu1 %v6547_v29 }
 0x723   : > { %6549 = vmatprep.subr.bf16.mxu1 %v6703_v2 }
 0x726   : > { %6551 = vmatpush3.bf16.msra.mxu1 %v6550_v30 }
 0x727   : > { %6552 = vmatprep.subr.bf16.mxu1 %v6703_v2 }
 0x7d8   : > { %v3596_v36 = vpop.f32.mrb[98].mxu1 }
 0x7d9   : > { %v5765_v55 = vpop.f32.mrb[99].mxu1 }
 0x7da   : > { %v4681_v55 = vld [vmem:[%s8411_s8 + $0x190] sm:$0xff] }
 0x7dc   : > { %v3687_v57 = vpop.f32.mrb[100].mxu1 }
 0x7dd   : > { %5804 = vmatmul.mubr.f32.vlgmr.msra.gmra.mrb[102].mxu1 %v3687_v57  ;;  %v5770_v48 = vpop.f32.mrb[101].mxu1  ;;  %v6607_v57 = vpack.c.bf16 %v4684_v38, %v4683_v37 }
 0x7de   : > { %6554 = vmatpush3.bf16.msra.mxu1 %v6553_v59  ;;  %5838 = vmatprep.mubr.msk.f32.mxu1 %vm6705_vm3, %v6706_v5  ;;  %v4682_v59 = vld [vmem:[%s8411_s8 + $0x198] sm:$0xff]  ;;  %v4685_v48 = vld [vmem:[%s8411_s8 + $0x1b0] sm:$0xff] }
 0x7df   : > { %6555 = vmatprep.subr.bf16.mxu1 %v6703_v2 }
 0x7e2   : > { %6557 = vmatpush3.bf16.msra.mxu1 %v6556_v40 }
 0x7e3   : > { %6558 = vmatprep.subr.bf16.mxu1 %v6703_v2 }
 0x7e6   : > { %6560 = vmatpush3.bf16.msra.mxu1 %v6559_v46  ;;  %v6613_v46 = vpack.c.bf16 %v4688_v44, %v4687_v41 }
 0x7e7   : > { %6561 = vmatprep.subr.bf16.mxu1 %v6703_v2 }
 0x7ea   : > { %6563 = vmatpush3.bf16.msra.mxu1 %v6562_v3  ;;  %v6616_v3 = vpack.c.bf16 %v4690_v49, %v4689_v47 }
 0x7eb   : > { %6564 = vmatprep.subr.bf16.mxu1 %v6703_v2 }
 0x7ee   : > { %6566 = vmatpush3.bf16.msra.mxu1 %v6565_v52  ;;  %v6619_v52 = vpack.c.bf16 %v4692_v62, %v4691_v50 }
 0x7ef   : > { %6567 = vmatprep.subr.bf16.mxu1 %v6703_v2 }
 0x7f2   : > { %6569 = vmatpush3.bf16.msra.mxu1 %v6568_v0  ;;  %v6622_v0 = vpack.c.bf16 %v4694_v60, %v4693_v12 }
 0x7f3   : > { %6570 = vmatprep.subr.bf16.mxu1 %v6703_v2 }
 0x7f6   : > { %6572 = vmatpush3.bf16.msra.mxu1 %v6571_v9  ;;  %v4179_v9 = vld [vmem:[%s8414_s11 + $0x10] sm:$0xff] }
 0x7f7   : > { %6573 = vmatprep.subr.bf16.mxu1 %v6703_v2 }
 0x7fa   : > { %6575 = vmatpush3.bf16.msra.mxu1 %v6574_v11  ;;  %v6628_v11 = vpack.c.bf16 %v4180_v43, %v4179_v9 }
 0x7fb   : > { %5841 = vmatprep.subr.mxu1 %v6706_v5 }
 0x7fc   : > { %6629 = vmatpush3.bf16.msra.mxu0 %v6628_v11 }
 0x7fd   : > { %5839 = vmatmul.mubr.f32.vlgmr.msra.gmra.mrb[104].mxu1 %v3596_v36  ;;  %v6601_v36 = vpack.c.bf16 %v4680_v10, %v4679_v61  ;;  %6630 = vmatprep.subr.bf16.mxu0 %v6703_v2 }
 0x7fe   : > { %5842 = vmatpush3.msk.msra.mxu1 %vm802_vm6, %v8065_v58  ;;  %5843 = vmatprep.mubr.msk.f32.mxu1 %vm6705_vm3, %v6706_v5 }
 0x7ff   : > { %6576 = vmatprep.subr.bf16.mxu1 %v6703_v2 }
 0x801   : > { %5844 = vmatmul.mubr.msk.f32.vlgmr.msra.gmra.mrb[106].mxu1 %vm3523_vm9, %v4657_v1  ;;  %v6631_v1 = vpack.c.bf16 %v4182_v19, %v4181_v63 }
 0x802   : > { %6578 = vmatpush3.bf16.msra.mxu1 %v6577_v45  ;;  %5878 = vmatprep.mubr.msk.f32.mxu1 %vm6705_vm3, %v6706_v5  ;;  %v4183_v45 = vld [vmem:[%s8414_s11 + $0x30] sm:$0xff] }
 0x803   : > { %6579 = vmatprep.subr.bf16.mxu1 %v6703_v2  ;;  %6632 = vmatpush3.bf16.msra.mxu0 %v6631_v1  ;;  %v6634_v39 = vpack.c.bf16 %v4184_v4, %v4183_v45 }
 0x804   : > { %6633 = vmatprep.subr.bf16.mxu0 %v6703_v2 }
 0x806   : > { %6581 = vmatpush3.bf16.msra.mxu1 %v6580_v28  ;;  %v4186_v28 = vld [vmem:[%s8414_s11 + $0x48] sm:$0xff] }
 0x807   : > { %6582 = vmatprep.subr.bf16.mxu1 %v6703_v2  ;;  %6635 = vmatpush3.bf16.msra.mxu0 %v6634_v39  ;;  %v6637_v51 = vpack.c.bf16 %v4186_v28, %v4185_v20 }
 0x808   : > { %6636 = vmatprep.subr.bf16.mxu0 %v6703_v2 }
 0x80a   : > { %6584 = vmatpush3.bf16.msra.mxu1 %v6583_v54  ;;  %v4187_v54 = vld [vmem:[%s8414_s11 + $0x50] sm:$0xff] }
 0x80b   : > { %6585 = vmatprep.subr.bf16.mxu1 %v6703_v2  ;;  %6638 = vmatpush3.bf16.msra.mxu0 %v6637_v51  ;;  %v6640_v13 = vpack.c.bf16 %v4188_v27, %v4187_v54 }
 0x80c   : > { %6639 = vmatprep.subr.bf16.mxu0 %v6703_v2 }
 0x80e   : > { %6587 = vmatpush3.bf16.msra.mxu1 %v6586_v53 }
 0x80f   : > { %6588 = vmatprep.subr.bf16.mxu1 %v6703_v2  ;;  %6641 = vmatpush3.bf16.msra.mxu0 %v6640_v13 }
 0x810   : > { %6642 = vmatprep.subr.bf16.mxu0 %v6703_v2 }
 0x812   : > { %6590 = vmatpush3.bf16.msra.mxu1 %v6589_v14 }
 0x813   : > { %6591 = vmatprep.subr.bf16.mxu1 %v6703_v2 }
 0x816   : > { %6593 = vmatpush3.bf16.msra.mxu1 %v6592_v16  ;;  %v4190_v16 = vld [vmem:[%s8414_s11 + $0x68] sm:$0xff] }
 0x817   : > { %6594 = vmatprep.subr.bf16.mxu1 %v6703_v2  ;;  %v6643_v17 = vpack.c.bf16 %v4190_v16, %v4189_v42 }
 0x819   : > { %6644 = vmatpush3.bf16.msra.mxu0 %v6643_v17 }
 0x81a   : > { %6596 = vmatpush3.bf16.msra.mxu1 %v6595_v21  ;;  %6645 = vmatprep.subr.bf16.mxu0 %v6703_v2  ;;  %v4192_v21 = vld [vmem:[%s8414_s11 + $0x78] sm:$0xff] }
 0x81b   : > { %6597 = vmatprep.subr.bf16.mxu1 %v6703_v2  ;;  %v6646_v22 = vpack.c.bf16 %v4192_v21, %v4191_v18 }
 0x81d   : > { %6647 = vmatpush3.bf16.msra.mxu0 %v6646_v22 }
 0x81e   : > { %6599 = vmatpush3.bf16.msra.mxu1 %v6598_v26  ;;  %v4174_v26 = vld [vmem:[%s8412_s9] sm:$0x1] }
 0x81f   : > { %5881 = vmatprep.subr.mxu1 %v6706_v5 }
 0x8b0   : > { %v3774_v35 = vpop.f32.mrb[102].mxu1 }
 0x8b1   : > { %v5805_v25 = vpop.f32.mrb[103].mxu1 }
 0x8d0   : > { %v3844_v7 = vpop.f32.mrb[104].mxu1 }
 0x8d1   : > { %v8266_v32 = vadd.f32 %v3844_v7, %v3774_v35  ;;  %v5840_v29 = vpop.f32.mrb[105].mxu1 }
 0x8d4   : > { %v3919_v30 = vpop.f32.mrb[106].mxu1 }
 0x8d5   : > { %5879 = vmatmul.mubr.f32.vlgmr.msra.gmra.mrb[108].mxu1 %v3919_v30  ;;  %v5845_v31 = vpop.f32.mrb[107].mxu1 }
 0x8d6   : > { %5882 = vmatpush3.msk.msra.mxu1 %vm802_vm6, %v8065_v58  ;;  %5883 = vmatprep.mubr.msk.f32.mxu1 %vm6705_vm3, %v6706_v5  ;;  %v6604_v58 = vpack.c.bf16 %v4682_v59, %v4681_v55 }
 0x8d7   : > { %6600 = vmatprep.subr.bf16.mxu1 %v6703_v2 }
 0x8d9   : > { %5884 = vmatmul.mubr.msk.f32.vlgmr.msra.gmra.mrb[110].mxu1 %vm3523_vm9, %v4676_v34 }
 0x8da   : > { %6602 = vmatpush3.bf16.msra.mxu1 %v6601_v36  ;;  %5918 = vmatprep.mubr.msk.f32.mxu1 %vm6705_vm3, %v6706_v5  ;;  %v4686_v5 = vld [vmem:[%s8411_s8 + $0x1b8] sm:$0xff] }
 0x8db   : > { %6603 = vmatprep.subr.bf16.mxu1 %v6703_v2  ;;  %v6610_v40 = vpack.c.bf16 %v4686_v5, %v4685_v48 }
 0x8de   : > { %6605 = vmatpush3.bf16.msra.mxu1 %v6604_v58 }
 0x8df   : > { %6606 = vmatprep.subr.bf16.mxu1 %v6703_v2 }
 0x8e2   : > { %6608 = vmatpush3.bf16.msra.mxu1 %v6607_v57 }
 0x8e3   : > { %6609 = vmatprep.subr.bf16.mxu1 %v6703_v2 }
 0x8e6   : > { %6611 = vmatpush3.bf16.msra.mxu1 %v6610_v40 }
 0x8e7   : > { %6612 = vmatprep.subr.bf16.mxu1 %v6703_v2 }
 0x8ea   : > { %6614 = vmatpush3.bf16.msra.mxu1 %v6613_v46 }
 0x8eb   : > { %6615 = vmatprep.subr.bf16.mxu1 %v6703_v2 }
 0x8ee   : > { %6617 = vmatpush3.bf16.msra.mxu1 %v6616_v3 }
 0x8ef   : > { %6618 = vmatprep.subr.bf16.mxu1 %v6703_v2 }
 0x8f2   : > { %6620 = vmatpush3.bf16.msra.mxu1 %v6619_v52 }
 0x8f3   : > { %6621 = vmatprep.subr.bf16.mxu1 %v6703_v2  ;;  %v4193_v2 = vld [vmem:[%s8415_s12] sm:$0x1] }
 0x8f6   : > { %6623 = vmatpush3.bf16.msra.mxu1 %v6622_v0 }
 0x9a8   : > { %v4006_v53 = vpop.f32.mrb[108].mxu1 }
 0x9a9   : > { %v4010_v56 = vadd.f32 %v4006_v53, %v8266_v32  ;;  %v5880_v33 = vpop.f32.mrb[109].mxu1 }
 0x9ac   : > { %v4082_v14 = vpop.f32.mrb[110].mxu1 }
 0x9ad   : > { %5919 = vmatmul.mubr.f32.vlgmr.msra.gmra.mrb[112].mxu1 %v4082_v14  ;;  %v5885_v15 = vpop.f32.mrb[111].mxu1 }
 0xa80   : > { %v4169_v24 = vpop.f32.mrb[112].mxu1 }
 0xa81   : > { %v4173_v35 = vadd.f32 %v4169_v24, %v4010_v56  ;;  %v5920_v25 = vpop.f32.mrb[113].mxu1 }
 0xa83   : > { %v4175_v7 = vadd.f32 %v4174_v26, %v4173_v35 }
 0xa85   : > { %v4176_v32 = vmax.f32 %v4175_v7, 0.0 }
 0xa87   : > { %5954 = vmatmul.mubr.f32.vlgmr.msra.gmra.mrb[56].mxu0 %v4176_v32 }
 0xb5a   : > { %v4260_v29 = vpop.f32.mrb[56].mxu0 }
 0xb5b   : > { %v4261_v61 = vadd.f32 %v4260_v29, %v4193_v2  ;;  %v5955_v10 = vpop.f32.mrb[57].mxu0 }
 0xb5d   : > { %4264 = vst [vmem:[%s436_s16] sm:$0x1] %v4261_v61 }
 0xb5e PF: > { %s23_s25 = sadd.s32 1, %s6701_s25  }
 0xb5f   : > { %p20_p4 = scmp.ge.s32.totalorder %s23_s25, 4  }
 0xb61   :  { %22 = sbr.rel (!%p20_p4) target bundleno = 1 (0x1), region = 130 }

</bundles_post_ra>
